<compile_context>
chip_gen: v5e
topology: v5e:2x2
jax: 0.10.0
libtpu: 0.0.40
codegen_flags: <defaults>
</compile_context>

<pallas_src>
import jax
import jax.numpy as jnp
from jax.experimental import pallas as pl
from jax.experimental.pallas import tpu as pltpu

EPS = 1e-6
_VMEM_LIMIT = 48 * 1024 * 1024  # explicit limit with headroom on every gen


def _cparams(sem):
    return pltpu.CompilerParams(dimension_semantics=sem,
                                vmem_limit_bytes=_VMEM_LIMIT)


def _stream_spec(block_shape, index_map, buffered):
    """BlockSpec for a streaming (per-tile) operand; 3-deep buffering only when
    the pipeline is long enough for it to matter."""
    if buffered:
        return pl.BlockSpec(block_shape, index_map, pipeline_mode=pl.Buffered(3))
    return pl.BlockSpec(block_shape, index_map)


def _round_up(x, m):
    return (x + m - 1) // m * m


def _choose_tiling(P, max_tile=4096, n_split=2):
    """Pad the pixel axis to a multiple of 128 and pick the largest tile
    (multiple of 128, <= max_tile) dividing it; prefer an even tile count so
    the reduction passes can be split across 2 TensorCores (v7x)."""
    Pp = _round_up(max(P, 1), 128)

    def best_tile(require_even):
        best, t = None, 128
        while t <= min(Pp, max_tile):
            if Pp % t == 0 and (not require_even or (Pp // t) % n_split == 0):
                best = t
            t += 128
        return best

    t = best_tile(True)
    if t is not None:
        return Pp, t, n_split
    t = best_tile(False)
    return Pp, (t if t is not None else 128), 1


def _pad_cols(a, Pp):
    P = a.shape[-1]
    if P == Pp:
        return a
    return jnp.pad(a, ((0, 0), (0, Pp - P)))


# ------------------------------ Pallas kernels ------------------------------

def _conv_stats_kernel(p_ref, w_ref, y_ref, s_ref, ss_ref):
    """Pass 1: y = w @ patches (written out, bf16) + per-channel partial
    (sum, sumsq) accumulated over the 'arbitrary' grid axis."""
    j = pl.program_id(1)
    y = jnp.dot(w_ref[...], p_ref[...], preferred_element_type=jnp.float32)
    y_ref[...] = y.astype(y_ref.dtype)

    @pl.when(j == 0)
    def _():
        s_ref[...] = jnp.zeros_like(s_ref)
        ss_ref[...] = jnp.zeros_like(ss_ref)

    s_ref[...] += jnp.sum(y, axis=1, keepdims=True)
    ss_ref[...] += jnp.sum(y * y, axis=1, keepdims=True)


def _conv_stats_fused_kernel(p_ref, w_ref, xc_ref, w3_ref, y_ref,
                             s_ref, ss_ref, s3_ref, ss3_ref):
    """Pass 1 of the 3x3 'in' conv, with the ActNorm stats of the 1x1 cond
    conv (y3 = w3 @ xc) fused in (same pixel grid, xc read once)."""
    j = pl.program_id(1)
    y = jnp.dot(w_ref[...], p_ref[...], preferred_element_type=jnp.float32)
    y_ref[...] = y.astype(y_ref.dtype)
    y3 = jnp.dot(w3_ref[...], xc_ref[...], preferred_element_type=jnp.float32)

    @pl.when(j == 0)
    def _():
        s_ref[...] = jnp.zeros_like(s_ref)
        ss_ref[...] = jnp.zeros_like(ss_ref)
        s3_ref[...] = jnp.zeros_like(s3_ref)
        ss3_ref[...] = jnp.zeros_like(ss3_ref)

    s_ref[...] += jnp.sum(y, axis=1, keepdims=True)
    ss_ref[...] += jnp.sum(y * y, axis=1, keepdims=True)
    s3_ref[...] += jnp.sum(y3, axis=1, keepdims=True)
    ss3_ref[...] += jnp.sum(y3 * y3, axis=1, keepdims=True)


def _norm_residual_kernel(y_ref, m_ref, i_ref, r_ref, o_ref):
    """Pass 2: out = residual + (y - mean) * inv_std (y from pass 1)."""
    y = y_ref[...].astype(jnp.float32)
    o_ref[...] = (r_ref[...].astype(jnp.float32)
                  + (y - m_ref[...]) * i_ref[...]).astype(o_ref.dtype)


def _norm_relu_kernel(y_ref, m_ref, i_ref, o_ref):
    """Pass 2: out = relu((y - mean) * inv_std) (y from pass 1)."""
    y = y_ref[...].astype(jnp.float32)
    o_ref[...] = jnp.maximum((y - m_ref[...]) * i_ref[...], 0.0).astype(o_ref.dtype)


def _fused_mid_kernel(xc_ref, w3_ref, m3_ref, i3_ref, h1_ref, w4_ref, mask_ref,
                      y4_ref, s4_ref, ss4_ref):
    """Fused 1x1 pair, pass 1: t2 = h1 + actnorm3(w3 @ xc) kept in VMEM only;
    y4 = w4 @ t2 is written out and its ActNorm partial sums accumulated.
    mask zeroes padded pixel columns so the stats stay exact."""
    j = pl.program_id(1)
    y3 = jnp.dot(w3_ref[...], xc_ref[...], preferred_element_type=jnp.float32)
    t2 = h1_ref[...].astype(jnp.float32) + (y3 - m3_ref[...]) * i3_ref[...]
    y4 = jnp.dot(w4_ref[...], t2.astype(w4_ref.dtype),
                 preferred_element_type=jnp.float32)
    y4 = y4 * mask_ref[...]
    y4_ref[...] = y4.astype(y4_ref.dtype)

    @pl.when(j == 0)
    def _():
        s4_ref[...] = jnp.zeros_like(s4_ref)
        ss4_ref[...] = jnp.zeros_like(ss4_ref)

    s4_ref[...] += jnp.sum(y4, axis=1, keepdims=True)
    ss4_ref[...] += jnp.sum(y4 * y4, axis=1, keepdims=True)


def _zeros_conv_kernel(p_ref, w_ref, b_ref, scale_ref, o_ref):
    """Conv2dZeros: out = (w @ patches + b) * scale (scale = exp(logs*3), hoisted)."""
    y = jnp.dot(w_ref[...], p_ref[...], preferred_element_type=jnp.float32)
    o_ref[...] = ((y + b_ref[...]) * scale_ref[...]).astype(o_ref.dtype)


# ------------------------------ call wrappers --------------------------------

def conv_stats(patches, w, tiling, out_dtype=jnp.bfloat16):
    K, Pp = patches.shape
    C = w.shape[0]
    _, tile, n_split = tiling
    steps = Pp // (tile * n_split)
    buffered = steps >= 4
    cost = pl.CostEstimate(
        flops=2 * C * K * Pp, transcendentals=0,
        bytes_accessed=(K * Pp + C * K + C * Pp) * 2 + 2 * n_split * C * 4)
    return pl.pallas_call(
        _conv_stats_kernel,
        out_shape=(jax.ShapeDtypeStruct((C, Pp), out_dtype),
                   jax.ShapeDtypeStruct((n_split, C, 1), jnp.float32),
                   jax.ShapeDtypeStruct((n_split, C, 1), jnp.float32)),
        grid=(n_split, steps),
        in_specs=[_stream_spec((K, tile), lambda c, j: (0, c * steps + j), buffered),
                  pl.BlockSpec((C, K), lambda c, j: (0, 0))],
        out_specs=(pl.BlockSpec((C, tile), lambda c, j: (0, c * steps + j)),
                   pl.BlockSpec((None, C, 1), lambda c, j: (c, 0, 0)),
                   pl.BlockSpec((None, C, 1), lambda c, j: (c, 0, 0))),
        compiler_params=_cparams(("parallel", "arbitrary")),
        cost_estimate=cost,
    )(patches, w)


def conv_stats_fused(patches, w, xc, w3, tiling, out_dtype=jnp.bfloat16):
    K, Pp = patches.shape
    C = w.shape[0]
    Cc = xc.shape[0]
    C3 = w3.shape[0]
    _, tile, n_split = tiling
    steps = Pp // (tile * n_split)
    buffered = steps >= 4
    cost = pl.CostEstimate(
        flops=2 * (C * K + C3 * Cc) * Pp, transcendentals=0,
        bytes_accessed=((K + Cc + C) * Pp + C * K + C3 * Cc) * 2
                       + 4 * n_split * (C + C3) * 4)
    return pl.pallas_call(
        _conv_stats_fused_kernel,
        out_shape=(jax.ShapeDtypeStruct((C, Pp), out_dtype),
                   jax.ShapeDtypeStruct((n_split, C, 1), jnp.float32),
                   jax.ShapeDtypeStruct((n_split, C, 1), jnp.float32),
                   jax.ShapeDtypeStruct((n_split, C3, 1), jnp.float32),
                   jax.ShapeDtypeStruct((n_split, C3, 1), jnp.float32)),
        grid=(n_split, steps),
        in_specs=[_stream_spec((K, tile), lambda c, j: (0, c * steps + j), buffered),
                  pl.BlockSpec((C, K), lambda c, j: (0, 0)),
                  _stream_spec((Cc, tile), lambda c, j: (0, c * steps + j), buffered),
                  pl.BlockSpec((C3, Cc), lambda c, j: (0, 0))],
        out_specs=(pl.BlockSpec((C, tile), lambda c, j: (0, c * steps + j)),
                   pl.BlockSpec((None, C, 1), lambda c, j: (c, 0, 0)),
                   pl.BlockSpec((None, C, 1), lambda c, j: (c, 0, 0)),
                   pl.BlockSpec((None, C3, 1), lambda c, j: (c, 0, 0)),
                   pl.BlockSpec((None, C3, 1), lambda c, j: (c, 0, 0))),
        compiler_params=_cparams(("parallel", "arbitrary")),
        cost_estimate=cost,
    )(patches, w, xc, w3)


def apply_residual(y, mean, inv, residual, tiling, out_dtype=jnp.bfloat16):
    C, Pp = y.shape
    _, tile, _ = tiling
    n_tiles = Pp // tile
    buffered = n_tiles >= 4
    cost = pl.CostEstimate(flops=3 * C * Pp, transcendentals=0,
                           bytes_accessed=3 * C * Pp * 2 + 2 * C * 4)
    return pl.pallas_call(
        _norm_residual_kernel,
        out_shape=jax.ShapeDtypeStruct((C, Pp), out_dtype),
        grid=(n_tiles,),
        in_specs=[_stream_spec((C, tile), lambda i: (0, i), buffered),
                  pl.BlockSpec((C, 1), lambda i: (0, 0)),
                  pl.BlockSpec((C, 1), lambda i: (0, 0)),
                  _stream_spec((C, tile), lambda i: (0, i), buffered)],
        out_specs=pl.BlockSpec((C, tile), lambda i: (0, i)),
        compiler_params=_cparams(("parallel",)),
        cost_estimate=cost,
    )(y, mean, inv, residual)


def apply_relu(y, mean, inv, tiling, out_dtype=jnp.bfloat16):
    C, Pp = y.shape
    _, tile, _ = tiling
    n_tiles = Pp // tile
    buffered = n_tiles >= 4
    cost = pl.CostEstimate(flops=3 * C * Pp, transcendentals=0,
                           bytes_accessed=2 * C * Pp * 2 + 2 * C * 4)
    return pl.pallas_call(
        _norm_relu_kernel,
        out_shape=jax.ShapeDtypeStruct((C, Pp), out_dtype),
        grid=(n_tiles,),
        in_specs=[_stream_spec((C, tile), lambda i: (0, i), buffered),
                  pl.BlockSpec((C, 1), lambda i: (0, 0)),
                  pl.BlockSpec((C, 1), lambda i: (0, 0))],
        out_specs=pl.BlockSpec((C, tile), lambda i: (0, i)),
        compiler_params=_cparams(("parallel",)),
        cost_estimate=cost,
    )(y, mean, inv)


def fused_mid(xc, w3, m3, i3, h1, w4, mask, tiling, out_dtype=jnp.bfloat16):
    Cc, Pp = xc.shape
    mid = w3.shape[0]
    _, tile, n_split = tiling
    steps = Pp // (tile * n_split)
    buffered = steps >= 4
    cost = pl.CostEstimate(
        flops=2 * (mid * Cc + mid * mid) * Pp + 4 * mid * Pp, transcendentals=0,
        bytes_accessed=((Cc + 2 * mid) * Pp + mid * Cc + mid * mid) * 2
                       + Pp * 4 + 4 * n_split * mid * 4)
    return pl.pallas_call(
        _fused_mid_kernel,
        out_shape=(jax.ShapeDtypeStruct((mid, Pp), out_dtype),
                   jax.ShapeDtypeStruct((n_split, mid, 1), jnp.float32),
                   jax.ShapeDtypeStruct((n_split, mid, 1), jnp.float32)),
        grid=(n_split, steps),
        in_specs=[_stream_spec((Cc, tile), lambda c, j: (0, c * steps + j), buffered),
                  pl.BlockSpec((mid, Cc), lambda c, j: (0, 0)),
                  pl.BlockSpec((mid, 1), lambda c, j: (0, 0)),
                  pl.BlockSpec((mid, 1), lambda c, j: (0, 0)),
                  _stream_spec((mid, tile), lambda c, j: (0, c * steps + j), buffered),
                  pl.BlockSpec((mid, mid), lambda c, j: (0, 0)),
                  pl.BlockSpec((1, tile), lambda c, j: (0, c * steps + j))],
        out_specs=(pl.BlockSpec((mid, tile), lambda c, j: (0, c * steps + j)),
                   pl.BlockSpec((None, mid, 1), lambda c, j: (c, 0, 0)),
                   pl.BlockSpec((None, mid, 1), lambda c, j: (c, 0, 0))),
        compiler_params=_cparams(("parallel", "arbitrary")),
        cost_estimate=cost,
    )(xc, w3, m3, i3, h1, w4, mask)


def conv_zeros(patches, w, b, scale, tiling):
    K, Pp = patches.shape
    C = w.shape[0]
    _, tile, _ = tiling
    n_tiles = Pp // tile
    buffered = n_tiles >= 4
    cost = pl.CostEstimate(flops=2 * C * K * Pp, transcendentals=0,
                           bytes_accessed=(K * Pp + C * K) * 2 + C * Pp * 4)
    return pl.pallas_call(
        _zeros_conv_kernel,
        out_shape=jax.ShapeDtypeStruct((C, Pp), jnp.float32),
        grid=(n_tiles,),
        in_specs=[_stream_spec((K, tile), lambda i: (0, i), buffered),
                  pl.BlockSpec((C, K), lambda i: (0, 0)),
                  pl.BlockSpec((C, 1), lambda i: (0, 0)),
                  pl.BlockSpec((C, 1), lambda i: (0, 0))],
        out_specs=pl.BlockSpec((C, tile), lambda i: (0, i)),
        compiler_params=_cparams(("parallel",)),
        cost_estimate=cost,
    )(patches, w, b, scale)


# ----------------------------------- glue ------------------------------------

def im2col3x3_cm(x_cm4):
    """Channel-major im2col: [C, N, H, W] -> [9*C, N*H*W] ('same' pad, stride 1).
    Built directly in the kernels' [K, P] layout (no trailing transpose).
    Row ordering is (tap=(dh,dw), c), matching weights flattened as
    [Cout, 3, 3, Cin] -> [Cout, 9*Cin]."""
    C, N, H, W = x_cm4.shape
    xp = jnp.pad(x_cm4, ((0, 0), (0, 0), (1, 1), (1, 1)))
    taps = [xp[:, :, dh:dh + H, dw:dw + W].reshape(C, N * H * W)
            for dh in range(3) for dw in range(3)]
    return jnp.concatenate(taps, axis=0)


def _finalize_stats(s_part, ss_part, count):
    """Combine per-core partial (sum, sumsq) -> (mean, 1/(sqrt(var)+eps)).
    Tiny [C,1] JAX ops; the rsqrt is exact (no approx reciprocal)."""
    s = jnp.sum(s_part, axis=0)
    ss = jnp.sum(ss_part, axis=0)
    m = s / count
    var = jnp.maximum(ss / count - m * m, 0.0)
    inv = 1.0 / (jnp.sqrt(var) + EPS)
    return m, inv


@jax.jit
def nn_forward(x, x_cond, params):
    """x: [N,Cin,H,W], x_cond: [N,Ccond,H,W] (NCHW, like the torch module)
    -> ([N,Cout,H,W], intermediates). Internals are channel-major [C, N*H*W]."""
    N, Cin, H, W = x.shape
    Cc = x_cond.shape[1]
    P = N * H * W
    mid = params["w_mid"].shape[0]
    Cout = params["w_out"].shape[0]
    tiling = _choose_tiling(P)
    Pp = tiling[0]
    bf = jnp.bfloat16
    cnt = float(P)

    # single NCHW -> channel-major relayout at the boundary; everything after
    # stays [C, P] (lane-dense) until the final output transpose.
    x_cm4 = jnp.transpose(x, (1, 0, 2, 3)).astype(bf)
    xc_cm4 = jnp.transpose(x_cond, (1, 0, 2, 3)).astype(bf)
    x_cm = _pad_cols(x_cm4.reshape(Cin, P), Pp)
    xc_cm = _pad_cols(xc_cm4.reshape(Cc, P), Pp)
    mask = _pad_cols(jnp.ones((1, P), jnp.float32), Pp)

    w_in_cond = params["w_in_cond"].astype(bf)
    w_in = params["w_in"].astype(bf)
    w_mid_cond = params["w_mid_cond"].astype(bf)
    w_mid = params["w_mid"].astype(bf)
    w_out = params["w_out"].astype(bf)
    b_out = params["b_out"].astype(jnp.float32)
    scale_out = jnp.exp(params["logs_out"].astype(jnp.float32) * 3.0)  # hoisted

    # layer 1: t1 = x + ActNorm(conv3x3(x_cond; w_in_cond))
    pc = _pad_cols(im2col3x3_cm(xc_cm4), Pp)
    y1, s1, ss1 = conv_stats(pc, w_in_cond, tiling)
    m1, i1 = _finalize_stats(s1, ss1, cnt)
    t1 = apply_residual(y1, m1, i1, x_cm, tiling)

    # layer 2 (+ fused stats of the 1x1 cond conv): h1 = relu(ActNorm(conv3x3(t1)))
    p1 = _pad_cols(im2col3x3_cm(t1[:, :P].reshape(Cin, N, H, W)), Pp)
    y2, s2, ss2, s3, ss3 = conv_stats_fused(p1, w_in, xc_cm, w_mid_cond, tiling)
    m2, i2 = _finalize_stats(s2, ss2, cnt)
    m3, i3 = _finalize_stats(s3, ss3, cnt)
    h1 = apply_relu(y2, m2, i2, tiling)

    # fused 1x1 pair: t2 = h1 + ActNorm(conv1x1(x_cond)); y4 = conv1x1(t2; w_mid)
    y4, s4, ss4 = fused_mid(xc_cm, w_mid_cond, m3, i3, h1, w_mid, mask, tiling)
    m4, i4 = _finalize_stats(s4, ss4, cnt)
    h2 = apply_relu(y4, m4, i4, tiling)

    # Conv2dZeros
    p2 = _pad_cols(im2col3x3_cm(h2[:, :P].reshape(mid, N, H, W)), Pp)
    out_cm = conv_zeros(p2, w_out, b_out, scale_out, tiling)

    out = jnp.transpose(out_cm[:, :P].reshape(Cout, N, H, W), (1, 0, 2, 3))
    aux = {"t1": t1[:, :P], "h1": h1[:, :P], "h2": h2[:, :P]}
    return out, aux


# --------------------------- pure-JAX reference -------------------------------

def _dot_hi(a, b):
    return jnp.dot(a, b, precision=jax.lax.Precision.HIGHEST)


def _ref_actnorm(y):
    m = jnp.mean(y, axis=1, keepdims=True)
    v = jnp.mean((y - m) ** 2, axis=1, keepdims=True)
    return (y - m) / (jnp.sqrt(v) + EPS)


def nn_forward_ref(x, x_cond, params):
    N, Cin, H, W = x.shape
    Cc = x_cond.shape[1]
    P = N * H * W
    mid = params["w_mid"].shape[0]
    Cout = params["w_out"].shape[0]
    x_cm = jnp.transpose(x, (1, 0, 2, 3)).reshape(Cin, P)
    xc_cm4 = jnp.transpose(x_cond, (1, 0, 2, 3))
    xc_cm = xc_cm4.reshape(Cc, P)
    t1 = x_cm + _ref_actnorm(_dot_hi(params["w_in_cond"], im2col3x3_cm(xc_cm4)))
    h1 = jnp.maximum(_ref_actnorm(
        _dot_hi(params["w_in"], im2col3x3_cm(t1.reshape(Cin, N, H, W)))), 0.0)
    t2 = h1 + _ref_actnorm(_dot_hi(params["w_mid_cond"], xc_cm))
    h2 = jnp.maximum(_ref_actnorm(_dot_hi(params["w_mid"], t2)), 0.0)
    out_cm = (_dot_hi(params["w_out"], im2col3x3_cm(h2.reshape(mid, N, H, W)))
              + params["b_out"]) * jnp.exp(params["logs_out"] * 3.0)
    return jnp.transpose(out_cm.reshape(Cout, N, H, W), (1, 0, 2, 3))


# ------------------------------------ main ------------------------------------

if __name__ == "__main__":
    in_channels, cond_channels, mid_channels, out_channels = 4, 4, 32, 8
    N, H, W = 2, 16, 16
    P = N * H * W
    f32 = jnp.float32
    bf = jnp.bfloat16

    key = jax.random.PRNGKey(0)
    k1, k2, k3, k4, kx, kc, k5, k6, k7, k8, k9 = jax.random.split(key, 11)

    # Conv weights stored out-channel-major [Cout, (kh*kw)*Cin]; a torch
    # checkpoint's [Cout,Cin,kh,kw] maps via .permute(0,2,3,1).reshape(...).
    params = {
        "w_in_cond": (0.05 * jax.random.normal(k1, (in_channels, 3, 3, cond_channels))
                      ).reshape(in_channels, 9 * cond_channels).astype(f32),
        "w_in": (0.05 * jax.random.normal(k2, (mid_channels, 3, 3, in_channels))
                 ).reshape(mid_channels, 9 * in_channels).astype(f32),
        "w_mid_cond": (0.05 * jax.random.normal(k3, (mid_channels, cond_channels))
                       ).astype(f32),
        "w_mid": (0.05 * jax.random.normal(k4, (mid_channels, mid_channels))
                  ).astype(f32),
        # Conv2dZeros: zero weight, zero bias, zero logs per module __init__.
        "w_out": jnp.zeros((out_channels, 9 * mid_channels), f32),
        "b_out": jnp.zeros((out_channels, 1), f32),
        "logs_out": jnp.zeros((out_channels, 1), f32),
    }

    x = jax.random.normal(kx, (N, in_channels, H, W), f32)         # NCHW
    x_cond = jax.random.normal(kc, (N, cond_channels, H, W), f32)  # NCHW

    out, aux = nn_forward(x, x_cond, params)
    out = jax.block_until_ready(out)

    # references (bf16-rounded operands, f32 math)
    def actn(y):
        m = jnp.mean(y, axis=1, keepdims=True)
        v = jnp.mean((y - m) ** 2, axis=1, keepdims=True)
        return (y - m) / (jnp.sqrt(v) + EPS)

    hi = _dot_hi
    w1f = params["w_in_cond"].astype(bf).astype(f32)
    w2f = params["w_in"].astype(bf).astype(f32)
    w3f = params["w_mid_cond"].astype(bf).astype(f32)
    w4f = params["w_mid"].astype(bf).astype(f32)

    x_cm = jnp.transpose(x, (1, 0, 2, 3)).reshape(in_channels, P)
    xc_cm4 = jnp.transpose(x_cond, (1, 0, 2, 3))
    xc_cm = xc_cm4.reshape(cond_channels, P)

    # check 1: layer 1 (3x3 cond conv + global ActNorm + residual)
    pc_f = im2col3x3_cm(xc_cm4.astype(bf)).astype(f32)
    t1_ref = x_cm.astype(bf).astype(f32) + actn(hi(w1f, pc_f))
    assert bool(jnp.allclose(aux["t1"].astype(f32), t1_ref, atol=5e-2, rtol=5e-2)), \
        "layer-1 kernel mismatch"

    # check 2: layer 2 from the kernel's own t1
    p1_f = im2col3x3_cm(aux["t1"].reshape(in_channels, N, H, W)).astype(f32)
    h1_ref = jnp.maximum(actn(hi(w2f, p1_f)), 0.0)
    assert bool(jnp.allclose(aux["h1"].astype(f32), h1_ref, atol=5e-2, rtol=5e-2)), \
        "layer-2 kernel mismatch"

    # check 3: fused 1x1 pair from the kernel's own h1
    t2_ref = aux["h1"].astype(f32) + actn(hi(w3f, xc_cm.astype(bf).astype(f32)))
    h2_ref = jnp.maximum(actn(hi(w4f, t2_ref)), 0.0)
    assert bool(jnp.allclose(aux["h2"].astype(f32), h2_ref, atol=7e-2, rtol=7e-2)), \
        "fused mid pair mismatch"

    # check 4: Conv2dZeros kernel with non-zero weights (unit check)
    wr = (0.05 * jax.random.normal(k5, (out_channels, 9 * mid_channels))).astype(f32)
    br = (0.1 * jax.random.normal(k6, (out_channels, 1))).astype(f32)
    lr = (0.1 * jax.random.normal(k7, (out_channels, 1))).astype(f32)
    tiling = _choose_tiling(P)
    p2_bf = im2col3x3_cm(aux["h2"].reshape(mid_channels, N, H, W))
    o_k = jax.block_until_ready(
        conv_zeros(_pad_cols(p2_bf, tiling[0]), wr.astype(bf), br,
                   jnp.exp(lr * 3.0), tiling))[:, :P]
    o_r = (hi(wr.astype(bf).astype(f32), p2_bf.astype(f32)) + br) * jnp.exp(lr * 3.0)
    assert bool(jnp.allclose(o_k, o_r, atol=3e-2, rtol=3e-2)), "out-conv kernel mismatch"

    # check 5: full forward vs pure-f32 reference (Conv2dZeros init => exact zeros)
    out_ref = nn_forward_ref(x, x_cond, params)
    assert out.shape == (N, out_channels, H, W)
    assert bool(jnp.all(jnp.isfinite(out)))
    assert bool(jnp.allclose(out, out_ref, atol=5e-2, rtol=5e-2)), "full forward mismatch"

    # check 6: non-128-divisible pixel count exercises the padding + mask path
    N2, H2, W2 = 1, 10, 11
    P2 = N2 * H2 * W2
    x2 = jax.random.normal(k8, (N2, in_channels, H2, W2), f32)
    xc2 = jax.random.normal(k9, (N2, cond_channels, H2, W2), f32)
    out2, aux2 = nn_forward(x2, xc2, params)
    out2 = jax.block_until_ready(out2)
    x2_cm = jnp.transpose(x2, (1, 0, 2, 3)).reshape(in_channels, P2)
    xc2_cm4 = jnp.transpose(xc2, (1, 0, 2, 3))
    t1_ref2 = x2_cm.astype(bf).astype(f32) + actn(
        hi(w1f, im2col3x3_cm(xc2_cm4.astype(bf)).astype(f32)))
    assert bool(jnp.allclose(aux2["t1"].astype(f32), t1_ref2, atol=5e-2, rtol=5e-2)), \
        "padded-path t1 mismatch"
    h1_ref2 = jnp.maximum(actn(hi(
        w2f, im2col3x3_cm(aux2["t1"].reshape(in_channels, N2, H2, W2)).astype(f32))), 0.0)
    assert bool(jnp.allclose(aux2["h1"].astype(f32), h1_ref2, atol=5e-2, rtol=5e-2)), \
        "padded-path h1 mismatch"
    t2_ref2 = aux2["h1"].astype(f32) + actn(
        hi(w3f, xc2_cm4.reshape(cond_channels, P2).astype(bf).astype(f32)))
    h2_ref2 = jnp.maximum(actn(hi(w4f, t2_ref2)), 0.0)
    assert bool(jnp.allclose(aux2["h2"].astype(f32), h2_ref2, atol=7e-2, rtol=7e-2)), \
        "padded-path h2 mismatch"
    assert out2.shape == (N2, out_channels, H2, W2)
    assert bool(jnp.all(jnp.isfinite(out2)))

    print("KERNEL_OK")
</pallas_src>

<mosaic_0001>
module attributes {stable_mosaic.version = 11 : i64} {
  func.func @_conv_stats_kernel(%arg0: i32, %arg1: i32, %arg2: memref<36x256xbf16, #tpu.memory_space<vmem>>, %arg3: memref<4x36xbf16, #tpu.memory_space<vmem>>, %arg4: memref<4x256xbf16, #tpu.memory_space<vmem>>, %arg5: memref<1x4x1xf32, #tpu.memory_space<vmem>>, %arg6: memref<1x4x1xf32, #tpu.memory_space<vmem>>) attributes {dimension_semantics = [#tpu.dimension_semantics<parallel>, #tpu.dimension_semantics<arbitrary>], iteration_bounds = array<i64: 2, 1>, scalar_prefetch = 0 : i64, scratch_operands = 0 : i64, tpu.core_type = #tpu.core_type<tc>, window_params = [{transform_indices = @transform_0, window_bounds = array<i64: 36, 256>}, {pipeline_mode = #tpu.pipeline_mode<synchronous>, transform_indices = @transform_1, window_bounds = array<i64: 4, 36>}, {transform_indices = @transform_2, window_bounds = array<i64: 4, 256>}, {transform_indices = @transform_3, window_bounds = array<i64: 1, 4, 1>}, {transform_indices = @transform_4, window_bounds = array<i64: 1, 4, 1>}]} {
    %c0 = arith.constant 0 : index
    %c0_0 = arith.constant 0 : index
    %0 = vector.load %arg3[%c0, %c0_0] : memref<4x36xbf16, #tpu.memory_space<vmem>>, vector<4x36xbf16>
    %c0_1 = arith.constant 0 : index
    %c0_2 = arith.constant 0 : index
    %1 = vector.load %arg2[%c0_1, %c0_2] : memref<36x256xbf16, #tpu.memory_space<vmem>>, vector<36x256xbf16>
    %cst = arith.constant dense<0.000000e+00> : vector<4x256xf32>
    %2 = tpu.matmul %0, %1, %cst {dimension_numbers = #tpu.dot_dimension_numbers<[1], [0], [0], [1], [0, 0, 1, 1], [], []>} : vector<4x36xbf16>, vector<36x256xbf16>, vector<4x256xf32> -> vector<4x256xf32>
    %3 = arith.truncf %2 : vector<4x256xf32> to vector<4x256xbf16>
    %c0_3 = arith.constant 0 : index
    %c0_4 = arith.constant 0 : index
    %4 = vector.load %arg4[%c0_3, %c0_4] : memref<4x256xbf16, #tpu.memory_space<vmem>>, vector<4x256xbf16>
    tpu.vector_store %arg4[%c0_3, %c0_4], %3 {strides = array<i32>} : memref<4x256xbf16, #tpu.memory_space<vmem>>, vector<4x256xbf16>,
    %c0_i32 = arith.constant 0 : i32
    %5 = arith.cmpi eq, %arg1, %c0_i32 : i32
    %6 = arith.extui %5 : i1 to i32
    %c0_i32_5 = arith.constant 0 : i32
    %7 = arith.cmpi ne, %6, %c0_i32_5 : i32
    scf.if %7 {
      %cst_20 = arith.constant 0.000000e+00 : f32
      %25 = vector.broadcast %cst_20 : f32 to vector<4x1xf32>
      %c0_21 = arith.constant 0 : index
      %c0_22 = arith.constant 0 : index
      %c0_23 = arith.constant 0 : index
      %26 = vector.load %arg5[%c0_21, %c0_22, %c0_23] : memref<1x4x1xf32, #tpu.memory_space<vmem>>, vector<1x4x1xf32>
      %27 = vector.shape_cast %26 : vector<1x4x1xf32> to vector<4x1xf32>
      %28 = vector.shape_cast %25 : vector<4x1xf32> to vector<1x4x1xf32>
      tpu.vector_store %arg5[%c0_21, %c0_22, %c0_23], %28 {strides = array<i32>} : memref<1x4x1xf32, #tpu.memory_space<vmem>>, vector<1x4x1xf32>,
      %cst_24 = arith.constant 0.000000e+00 : f32
      %29 = vector.broadcast %cst_24 : f32 to vector<4x1xf32>
      %c0_25 = arith.constant 0 : index
      %c0_26 = arith.constant 0 : index
      %c0_27 = arith.constant 0 : index
      %30 = vector.load %arg6[%c0_25, %c0_26, %c0_27] : memref<1x4x1xf32, #tpu.memory_space<vmem>>, vector<1x4x1xf32>
      %31 = vector.shape_cast %30 : vector<1x4x1xf32> to vector<4x1xf32>
      %32 = vector.shape_cast %29 : vector<4x1xf32> to vector<1x4x1xf32>
      tpu.vector_store %arg6[%c0_25, %c0_26, %c0_27], %32 {strides = array<i32>} : memref<1x4x1xf32, #tpu.memory_space<vmem>>, vector<1x4x1xf32>,
    } else {
    }
    %c0_6 = arith.constant 0 : index
    %c0_7 = arith.constant 0 : index
    %c0_8 = arith.constant 0 : index
    %8 = vector.load %arg5[%c0_6, %c0_7, %c0_8] : memref<1x4x1xf32, #tpu.memory_space<vmem>>, vector<1x4x1xf32>
    %9 = vector.shape_cast %8 : vector<1x4x1xf32> to vector<4x1xf32>
    %cst_9 = arith.constant dense<0.000000e+00> : vector<4xf32>
    %10 = vector.multi_reduction <add>, %2, %cst_9 [1] : vector<4x256xf32> to vector<4xf32>
    %11 = vector.shape_cast %10 : vector<4xf32> to vector<4x1xf32>
    %12 = arith.addf %9, %11 : vector<4x1xf32>
    %c0_10 = arith.constant 0 : index
    %c0_11 = arith.constant 0 : index
    %c0_12 = arith.constant 0 : index
    %13 = vector.load %arg5[%c0_10, %c0_11, %c0_12] : memref<1x4x1xf32, #tpu.memory_space<vmem>>, vector<1x4x1xf32>
    %14 = vector.shape_cast %13 : vector<1x4x1xf32> to vector<4x1xf32>
    %15 = vector.shape_cast %12 : vector<4x1xf32> to vector<1x4x1xf32>
    tpu.vector_store %arg5[%c0_10, %c0_11, %c0_12], %15 {strides = array<i32>} : memref<1x4x1xf32, #tpu.memory_space<vmem>>, vector<1x4x1xf32>,
    %c0_13 = arith.constant 0 : index
    %c0_14 = arith.constant 0 : index
    %c0_15 = arith.constant 0 : index
    %16 = vector.load %arg6[%c0_13, %c0_14, %c0_15] : memref<1x4x1xf32, #tpu.memory_space<vmem>>, vector<1x4x1xf32>
    %17 = vector.shape_cast %16 : vector<1x4x1xf32> to vector<4x1xf32>
    %18 = arith.mulf %2, %2 : vector<4x256xf32>
    %cst_16 = arith.constant dense<0.000000e+00> : vector<4xf32>
    %19 = vector.multi_reduction <add>, %18, %cst_16 [1] : vector<4x256xf32> to vector<4xf32>
    %20 = vector.shape_cast %19 : vector<4xf32> to vector<4x1xf32>
    %21 = arith.addf %17, %20 : vector<4x1xf32>
    %c0_17 = arith.constant 0 : index
    %c0_18 = arith.constant 0 : index
    %c0_19 = arith.constant 0 : index
    %22 = vector.load %arg6[%c0_17, %c0_18, %c0_19] : memref<1x4x1xf32, #tpu.memory_space<vmem>>, vector<1x4x1xf32>
    %23 = vector.shape_cast %22 : vector<1x4x1xf32> to vector<4x1xf32>
    %24 = vector.shape_cast %21 : vector<4x1xf32> to vector<1x4x1xf32>
    tpu.vector_store %arg6[%c0_17, %c0_18, %c0_19], %24 {strides = array<i32>} : memref<1x4x1xf32, #tpu.memory_space<vmem>>, vector<1x4x1xf32>,
    return
  }
  func.func @transform_0(%arg0: i32, %arg1: i32) -> (i32, i32) {
    %c1_i32 = arith.constant 1 : i32
    %0 = arith.muli %arg0, %c1_i32 : i32
    %1 = arith.addi %0, %arg1 : i32
    %c0_i32 = arith.constant 0 : i32
    %c0_i32_0 = arith.constant 0 : i32
    return %c0_i32, %1 : i32, i32
  }
  func.func @transform_1(%arg0: i32, %arg1: i32) -> (i32, i32) {
    %c0_i32 = arith.constant 0 : i32
    %c0_i32_0 = arith.constant 0 : i32
    %c0_i32_1 = arith.constant 0 : i32
    return %c0_i32, %c0_i32_0 : i32, i32
  }
  func.func @transform_2(%arg0: i32, %arg1: i32) -> (i32, i32) {
    %c1_i32 = arith.constant 1 : i32
    %0 = arith.muli %arg0, %c1_i32 : i32
    %1 = arith.addi %0, %arg1 : i32
    %c0_i32 = arith.constant 0 : i32
    %c0_i32_0 = arith.constant 0 : i32
    return %c0_i32, %1 : i32, i32
  }
  func.func @transform_3(%arg0: i32, %arg1: i32) -> (i32, i32, i32) {
    %c0_i32 = arith.constant 0 : i32
    %c0_i32_0 = arith.constant 0 : i32
    %c0_i32_1 = arith.constant 0 : i32
    return %arg0, %c0_i32, %c0_i32_0 : i32, i32, i32
  }
  func.func @transform_4(%arg0: i32, %arg1: i32) -> (i32, i32, i32) {
    %c0_i32 = arith.constant 0 : i32
    %c0_i32_0 = arith.constant 0 : i32
    %c0_i32_1 = arith.constant 0 : i32
    return %arg0, %c0_i32, %c0_i32_0 : i32, i32, i32
  }
}

module attributes {stable_mosaic.version = 11 : i64} {
  func.func @_norm_residual_kernel(%arg0: i32, %arg1: memref<4x256xbf16, #tpu.memory_space<vmem>>, %arg2: memref<4x1xf32, #tpu.memory_space<vmem>>, %arg3: memref<4x1xf32, #tpu.memory_space<vmem>>, %arg4: memref<4x256xbf16, #tpu.memory_space<vmem>>, %arg5: memref<4x256xbf16, #tpu.memory_space<vmem>>) attributes {dimension_semantics = [#tpu.dimension_semantics<parallel>], iteration_bounds = array<i64: 2>, scalar_prefetch = 0 : i64, scratch_operands = 0 : i64, tpu.core_type = #tpu.core_type<tc>, window_params = [{transform_indices = @transform_0, window_bounds = array<i64: 4, 256>}, {pipeline_mode = #tpu.pipeline_mode<synchronous>, transform_indices = @transform_1, window_bounds = array<i64: 4, 1>}, {pipeline_mode = #tpu.pipeline_mode<synchronous>, transform_indices = @transform_2, window_bounds = array<i64: 4, 1>}, {transform_indices = @transform_3, window_bounds = array<i64: 4, 256>}, {transform_indices = @transform_4, window_bounds = array<i64: 4, 256>}]} {
    %c0 = arith.constant 0 : index
    %c0_0 = arith.constant 0 : index
    %0 = vector.load %arg1[%c0, %c0_0] : memref<4x256xbf16, #tpu.memory_space<vmem>>, vector<4x256xbf16>
    %1 = arith.extf %0 : vector<4x256xbf16> to vector<4x256xf32>
    %c0_1 = arith.constant 0 : index
    %c0_2 = arith.constant 0 : index
    %2 = vector.load %arg4[%c0_1, %c0_2] : memref<4x256xbf16, #tpu.memory_space<vmem>>, vector<4x256xbf16>
    %3 = arith.extf %2 : vector<4x256xbf16> to vector<4x256xf32>
    %c0_3 = arith.constant 0 : index
    %c0_4 = arith.constant 0 : index
    %4 = vector.load %arg2[%c0_3, %c0_4] : memref<4x1xf32, #tpu.memory_space<vmem>>, vector<4x1xf32>
    %5 = vector.broadcast %4 : vector<4x1xf32> to vector<4x256xf32>
    %6 = arith.subf %1, %5 : vector<4x256xf32>
    %c0_5 = arith.constant 0 : index
    %c0_6 = arith.constant 0 : index
    %7 = vector.load %arg3[%c0_5, %c0_6] : memref<4x1xf32, #tpu.memory_space<vmem>>, vector<4x1xf32>
    %8 = vector.broadcast %7 : vector<4x1xf32> to vector<4x256xf32>
    %9 = arith.mulf %6, %8 : vector<4x256xf32>
    %10 = arith.addf %3, %9 : vector<4x256xf32>
    %11 = arith.truncf %10 : vector<4x256xf32> to vector<4x256xbf16>
    %c0_7 = arith.constant 0 : index
    %c0_8 = arith.constant 0 : index
    %12 = vector.load %arg5[%c0_7, %c0_8] : memref<4x256xbf16, #tpu.memory_space<vmem>>, vector<4x256xbf16>
    tpu.vector_store %arg5[%c0_7, %c0_8], %11 {strides = array<i32>} : memref<4x256xbf16, #tpu.memory_space<vmem>>, vector<4x256xbf16>,
    return
  }
  func.func @transform_0(%arg0: i32) -> (i32, i32) {
    %c0_i32 = arith.constant 0 : i32
    %c0_i32_0 = arith.constant 0 : i32
    return %c0_i32, %arg0 : i32, i32
  }
  func.func @transform_1(%arg0: i32) -> (i32, i32) {
    %c0_i32 = arith.constant 0 : i32
    %c0_i32_0 = arith.constant 0 : i32
    %c0_i32_1 = arith.constant 0 : i32
    return %c0_i32, %c0_i32_0 : i32, i32
  }
  func.func @transform_2(%arg0: i32) -> (i32, i32) {
    %c0_i32 = arith.constant 0 : i32
    %c0_i32_0 = arith.constant 0 : i32
    %c0_i32_1 = arith.constant 0 : i32
    return %c0_i32, %c0_i32_0 : i32, i32
  }
  func.func @transform_3(%arg0: i32) -> (i32, i32) {
    %c0_i32 = arith.constant 0 : i32
    %c0_i32_0 = arith.constant 0 : i32
    return %c0_i32, %arg0 : i32, i32
  }
  func.func @transform_4(%arg0: i32) -> (i32, i32) {
    %c0_i32 = arith.constant 0 : i32
    %c0_i32_0 = arith.constant 0 : i32
    return %c0_i32, %arg0 : i32, i32
  }
}

module attributes {stable_mosaic.version = 11 : i64} {
  func.func @_conv_stats_fused_kernel(%arg0: i32, %arg1: i32, %arg2: memref<36x256xbf16, #tpu.memory_space<vmem>>, %arg3: memref<32x36xbf16, #tpu.memory_space<vmem>>, %arg4: memref<4x256xbf16, #tpu.memory_space<vmem>>, %arg5: memref<32x4xbf16, #tpu.memory_space<vmem>>, %arg6: memref<32x256xbf16, #tpu.memory_space<vmem>>, %arg7: memref<1x32x1xf32, #tpu.memory_space<vmem>>, %arg8: memref<1x32x1xf32, #tpu.memory_space<vmem>>, %arg9: memref<1x32x1xf32, #tpu.memory_space<vmem>>, %arg10: memref<1x32x1xf32, #tpu.memory_space<vmem>>) attributes {dimension_semantics = [#tpu.dimension_semantics<parallel>, #tpu.dimension_semantics<arbitrary>], iteration_bounds = array<i64: 2, 1>, scalar_prefetch = 0 : i64, scratch_operands = 0 : i64, tpu.core_type = #tpu.core_type<tc>, window_params = [{transform_indices = @transform_0, window_bounds = array<i64: 36, 256>}, {pipeline_mode = #tpu.pipeline_mode<synchronous>, transform_indices = @transform_1, window_bounds = array<i64: 32, 36>}, {transform_indices = @transform_2, window_bounds = array<i64: 4, 256>}, {pipeline_mode = #tpu.pipeline_mode<synchronous>, transform_indices = @transform_3, window_bounds = array<i64: 32, 4>}, {transform_indices = @transform_4, window_bounds = array<i64: 32, 256>}, {transform_indices = @transform_5, window_bounds = array<i64: 1, 32, 1>}, {transform_indices = @transform_6, window_bounds = array<i64: 1, 32, 1>}, {transform_indices = @transform_7, window_bounds = array<i64: 1, 32, 1>}, {transform_indices = @transform_8, window_bounds = array<i64: 1, 32, 1>}]} {
    %c0 = arith.constant 0 : index
    %c0_0 = arith.constant 0 : index
    %0 = vector.load %arg3[%c0, %c0_0] : memref<32x36xbf16, #tpu.memory_space<vmem>>, vector<32x36xbf16>
    %c0_1 = arith.constant 0 : index
    %c0_2 = arith.constant 0 : index
    %1 = vector.load %arg2[%c0_1, %c0_2] : memref<36x256xbf16, #tpu.memory_space<vmem>>, vector<36x256xbf16>
    %cst = arith.constant dense<0.000000e+00> : vector<32x256xf32>
    %2 = tpu.matmul %0, %1, %cst {dimension_numbers = #tpu.dot_dimension_numbers<[1], [0], [0], [1], [0, 0, 1, 1], [], []>} : vector<32x36xbf16>, vector<36x256xbf16>, vector<32x256xf32> -> vector<32x256xf32>
    %3 = arith.truncf %2 : vector<32x256xf32> to vector<32x256xbf16>
    %c0_3 = arith.constant 0 : index
    %c0_4 = arith.constant 0 : index
    %4 = vector.load %arg6[%c0_3, %c0_4] : memref<32x256xbf16, #tpu.memory_space<vmem>>, vector<32x256xbf16>
    tpu.vector_store %arg6[%c0_3, %c0_4], %3 {strides = array<i32>} : memref<32x256xbf16, #tpu.memory_space<vmem>>, vector<32x256xbf16>,
    %c0_5 = arith.constant 0 : index
    %c0_6 = arith.constant 0 : index
    %5 = vector.load %arg5[%c0_5, %c0_6] : memref<32x4xbf16, #tpu.memory_space<vmem>>, vector<32x4xbf16>
    %c0_7 = arith.constant 0 : index
    %c0_8 = arith.constant 0 : index
    %6 = vector.load %arg4[%c0_7, %c0_8] : memref<4x256xbf16, #tpu.memory_space<vmem>>, vector<4x256xbf16>
    %cst_9 = arith.constant dense<0.000000e+00> : vector<32x256xf32>
    %7 = tpu.matmul %5, %6, %cst_9 {dimension_numbers = #tpu.dot_dimension_numbers<[1], [0], [0], [1], [0, 0, 1, 1], [], []>} : vector<32x4xbf16>, vector<4x256xbf16>, vector<32x256xf32> -> vector<32x256xf32>
    %c0_i32 = arith.constant 0 : i32
    %8 = arith.cmpi eq, %arg1, %c0_i32 : i32
    %9 = arith.extui %8 : i1 to i32
    %c0_i32_10 = arith.constant 0 : i32
    %10 = arith.cmpi ne, %9, %c0_i32_10 : i32
    scf.if %10 {
      %cst_39 = arith.constant 0.000000e+00 : f32
      %45 = vector.broadcast %cst_39 : f32 to vector<32x1xf32>
      %c0_40 = arith.constant 0 : index
      %c0_41 = arith.constant 0 : index
      %c0_42 = arith.constant 0 : index
      %46 = vector.load %arg7[%c0_40, %c0_41, %c0_42] : memref<1x32x1xf32, #tpu.memory_space<vmem>>, vector<1x32x1xf32>
      %47 = vector.shape_cast %46 : vector<1x32x1xf32> to vector<32x1xf32>
      %48 = vector.shape_cast %45 : vector<32x1xf32> to vector<1x32x1xf32>
      tpu.vector_store %arg7[%c0_40, %c0_41, %c0_42], %48 {strides = array<i32>} : memref<1x32x1xf32, #tpu.memory_space<vmem>>, vector<1x32x1xf32>,
      %cst_43 = arith.constant 0.000000e+00 : f32
      %49 = vector.broadcast %cst_43 : f32 to vector<32x1xf32>
      %c0_44 = arith.constant 0 : index
      %c0_45 = arith.constant 0 : index
      %c0_46 = arith.constant 0 : index
      %50 = vector.load %arg8[%c0_44, %c0_45, %c0_46] : memref<1x32x1xf32, #tpu.memory_space<vmem>>, vector<1x32x1xf32>
      %51 = vector.shape_cast %50 : vector<1x32x1xf32> to vector<32x1xf32>
      %52 = vector.shape_cast %49 : vector<32x1xf32> to vector<1x32x1xf32>
      tpu.vector_store %arg8[%c0_44, %c0_45, %c0_46], %52 {strides = array<i32>} : memref<1x32x1xf32, #tpu.memory_space<vmem>>, vector<1x32x1xf32>,
      %cst_47 = arith.constant 0.000000e+00 : f32
      %53 = vector.broadcast %cst_47 : f32 to vector<32x1xf32>
      %c0_48 = arith.constant 0 : index
      %c0_49 = arith.constant 0 : index
      %c0_50 = arith.constant 0 : index
      %54 = vector.load %arg9[%c0_48, %c0_49, %c0_50] : memref<1x32x1xf32, #tpu.memory_space<vmem>>, vector<1x32x1xf32>
      %55 = vector.shape_cast %54 : vector<1x32x1xf32> to vector<32x1xf32>
      %56 = vector.shape_cast %53 : vector<32x1xf32> to vector<1x32x1xf32>
      tpu.vector_store %arg9[%c0_48, %c0_49, %c0_50], %56 {strides = array<i32>} : memref<1x32x1xf32, #tpu.memory_space<vmem>>, vector<1x32x1xf32>,
      %cst_51 = arith.constant 0.000000e+00 : f32
      %57 = vector.broadcast %cst_51 : f32 to vector<32x1xf32>
      %c0_52 = arith.constant 0 : index
      %c0_53 = arith.constant 0 : index
      %c0_54 = arith.constant 0 : index
      %58 = vector.load %arg10[%c0_52, %c0_53, %c0_54] : memref<1x32x1xf32, #tpu.memory_space<vmem>>, vector<1x32x1xf32>
      %59 = vector.shape_cast %58 : vector<1x32x1xf32> to vector<32x1xf32>
      %60 = vector.shape_cast %57 : vector<32x1xf32> to vector<1x32x1xf32>
      tpu.vector_store %arg10[%c0_52, %c0_53, %c0_54], %60 {strides = array<i32>} : memref<1x32x1xf32, #tpu.memory_space<vmem>>, vector<1x32x1xf32>,
    } else {
    }
    %c0_11 = arith.constant 0 : index
    %c0_12 = arith.constant 0 : index
    %c0_13 = arith.constant 0 : index
    %11 = vector.load %arg7[%c0_11, %c0_12, %c0_13] : memref<1x32x1xf32, #tpu.memory_space<vmem>>, vector<1x32x1xf32>
    %12 = vector.shape_cast %11 : vector<1x32x1xf32> to vector<32x1xf32>
    %cst_14 = arith.constant dense<0.000000e+00> : vector<32xf32>
    %13 = vector.multi_reduction <add>, %2, %cst_14 [1] : vector<32x256xf32> to vector<32xf32>
    %14 = vector.shape_cast %13 : vector<32xf32> to vector<32x1xf32>
    %15 = arith.addf %12, %14 : vector<32x1xf32>
    %c0_15 = arith.constant 0 : index
    %c0_16 = arith.constant 0 : index
    %c0_17 = arith.constant 0 : index
    %16 = vector.load %arg7[%c0_15, %c0_16, %c0_17] : memref<1x32x1xf32, #tpu.memory_space<vmem>>, vector<1x32x1xf32>
    %17 = vector.shape_cast %16 : vector<1x32x1xf32> to vector<32x1xf32>
    %18 = vector.shape_cast %15 : vector<32x1xf32> to vector<1x32x1xf32>
    tpu.vector_store %arg7[%c0_15, %c0_16, %c0_17], %18 {strides = array<i32>} : memref<1x32x1xf32, #tpu.memory_space<vmem>>, vector<1x32x1xf32>,
    %c0_18 = arith.constant 0 : index
    %c0_19 = arith.constant 0 : index
    %c0_20 = arith.constant 0 : index
    %19 = vector.load %arg8[%c0_18, %c0_19, %c0_20] : memref<1x32x1xf32, #tpu.memory_space<vmem>>, vector<1x32x1xf32>
    %20 = vector.shape_cast %19 : vector<1x32x1xf32> to vector<32x1xf32>
    %21 = arith.mulf %2, %2 : vector<32x256xf32>
    %cst_21 = arith.constant dense<0.000000e+00> : vector<32xf32>
    %22 = vector.multi_reduction <add>, %21, %cst_21 [1] : vector<32x256xf32> to vector<32xf32>
    %23 = vector.shape_cast %22 : vector<32xf32> to vector<32x1xf32>
    %24 = arith.addf %20, %23 : vector<32x1xf32>
    %c0_22 = arith.constant 0 : index
    %c0_23 = arith.constant 0 : index
    %c0_24 = arith.constant 0 : index
    %25 = vector.load %arg8[%c0_22, %c0_23, %c0_24] : memref<1x32x1xf32, #tpu.memory_space<vmem>>, vector<1x32x1xf32>
    %26 = vector.shape_cast %25 : vector<1x32x1xf32> to vector<32x1xf32>
    %27 = vector.shape_cast %24 : vector<32x1xf32> to vector<1x32x1xf32>
    tpu.vector_store %arg8[%c0_22, %c0_23, %c0_24], %27 {strides = array<i32>} : memref<1x32x1xf32, #tpu.memory_space<vmem>>, vector<1x32x1xf32>,
    %c0_25 = arith.constant 0 : index
    %c0_26 = arith.constant 0 : index
    %c0_27 = arith.constant 0 : index
    %28 = vector.load %arg9[%c0_25, %c0_26, %c0_27] : memref<1x32x1xf32, #tpu.memory_space<vmem>>, vector<1x32x1xf32>
    %29 = vector.shape_cast %28 : vector<1x32x1xf32> to vector<32x1xf32>
    %cst_28 = arith.constant dense<0.000000e+00> : vector<32xf32>
    %30 = vector.multi_reduction <add>, %7, %cst_28 [1] : vector<32x256xf32> to vector<32xf32>
    %31 = vector.shape_cast %30 : vector<32xf32> to vector<32x1xf32>
    %32 = arith.addf %29, %31 : vector<32x1xf32>
    %c0_29 = arith.constant 0 : index
    %c0_30 = arith.constant 0 : index
    %c0_31 = arith.constant 0 : index
    %33 = vector.load %arg9[%c0_29, %c0_30, %c0_31] : memref<1x32x1xf32, #tpu.memory_space<vmem>>, vector<1x32x1xf32>
    %34 = vector.shape_cast %33 : vector<1x32x1xf32> to vector<32x1xf32>
    %35 = vector.shape_cast %32 : vector<32x1xf32> to vector<1x32x1xf32>
    tpu.vector_store %arg9[%c0_29, %c0_30, %c0_31], %35 {strides = array<i32>} : memref<1x32x1xf32, #tpu.memory_space<vmem>>, vector<1x32x1xf32>,
    %c0_32 = arith.constant 0 : index
    %c0_33 = arith.constant 0 : index
    %c0_34 = arith.constant 0 : index
    %36 = vector.load %arg10[%c0_32, %c0_33, %c0_34] : memref<1x32x1xf32, #tpu.memory_space<vmem>>, vector<1x32x1xf32>
    %37 = vector.shape_cast %36 : vector<1x32x1xf32> to vector<32x1xf32>
    %38 = arith.mulf %7, %7 : vector<32x256xf32>
    %cst_35 = arith.constant dense<0.000000e+00> : vector<32xf32>
    %39 = vector.multi_reduction <add>, %38, %cst_35 [1] : vector<32x256xf32> to vector<32xf32>
    %40 = vector.shape_cast %39 : vector<32xf32> to vector<32x1xf32>
    %41 = arith.addf %37, %40 : vector<32x1xf32>
    %c0_36 = arith.constant 0 : index
    %c0_37 = arith.constant 0 : index
    %c0_38 = arith.constant 0 : index
    %42 = vector.load %arg10[%c0_36, %c0_37, %c0_38] : memref<1x32x1xf32, #tpu.memory_space<vmem>>, vector<1x32x1xf32>
    %43 = vector.shape_cast %42 : vector<1x32x1xf32> to vector<32x1xf32>
    %44 = vector.shape_cast %41 : vector<32x1xf32> to vector<1x32x1xf32>
    tpu.vector_store %arg10[%c0_36, %c0_37, %c0_38], %44 {strides = array<i32>} : memref<1x32x1xf32, #tpu.memory_space<vmem>>, vector<1x32x1xf32>,
    return
  }
  func.func @transform_0(%arg0: i32, %arg1: i32) -> (i32, i32) {
    %c1_i32 = arith.constant 1 : i32
    %0 = arith.muli %arg0, %c1_i32 : i32
    %1 = arith.addi %0, %arg1 : i32
    %c0_i32 = arith.constant 0 : i32
    %c0_i32_0 = arith.constant 0 : i32
    return %c0_i32, %1 : i32, i32
  }
  func.func @transform_1(%arg0: i32, %arg1: i32) -> (i32, i32) {
    %c0_i32 = arith.constant 0 : i32
    %c0_i32_0 = arith.constant 0 : i32
    %c0_i32_1 = arith.constant 0 : i32
    return %c0_i32, %c0_i32_0 : i32, i32
  }
  func.func @transform_2(%arg0: i32, %arg1: i32) -> (i32, i32) {
    %c1_i32 = arith.constant 1 : i32
    %0 = arith.muli %arg0, %c1_i32 : i32
    %1 = arith.addi %0, %arg1 : i32
    %c0_i32 = arith.constant 0 : i32
    %c0_i32_0 = arith.constant 0 : i32
    return %c0_i32, %1 : i32, i32
  }
  func.func @transform_3(%arg0: i32, %arg1: i32) -> (i32, i32) {
    %c0_i32 = arith.constant 0 : i32
    %c0_i32_0 = arith.constant 0 : i32
    %c0_i32_1 = arith.constant 0 : i32
    return %c0_i32, %c0_i32_0 : i32, i32
  }
  func.func @transform_4(%arg0: i32, %arg1: i32) -> (i32, i32) {
    %c1_i32 = arith.constant 1 : i32
    %0 = arith.muli %arg0, %c1_i32 : i32
    %1 = arith.addi %0, %arg1 : i32
    %c0_i32 = arith.constant 0 : i32
    %c0_i32_0 = arith.constant 0 : i32
    return %c0_i32, %1 : i32, i32
  }
  func.func @transform_5(%arg0: i32, %arg1: i32) -> (i32, i32, i32) {
    %c0_i32 = arith.constant 0 : i32
    %c0_i32_0 = arith.constant 0 : i32
    %c0_i32_1 = arith.constant 0 : i32
    return %arg0, %c0_i32, %c0_i32_0 : i32, i32, i32
  }
  func.func @transform_6(%arg0: i32, %arg1: i32) -> (i32, i32, i32) {
    %c0_i32 = arith.constant 0 : i32
    %c0_i32_0 = arith.constant 0 : i32
    %c0_i32_1 = arith.constant 0 : i32
    return %arg0, %c0_i32, %c0_i32_0 : i32, i32, i32
  }
  func.func @transform_7(%arg0: i32, %arg1: i32) -> (i32, i32, i32) {
    %c0_i32 = arith.constant 0 : i32
    %c0_i32_0 = arith.constant 0 : i32
    %c0_i32_1 = arith.constant 0 : i32
    return %arg0, %c0_i32, %c0_i32_0 : i32, i32, i32
  }
  func.func @transform_8(%arg0: i32, %arg1: i32) -> (i32, i32, i32) {
    %c0_i32 = arith.constant 0 : i32
    %c0_i32_0 = arith.constant 0 : i32
    %c0_i32_1 = arith.constant 0 : i32
    return %arg0, %c0_i32, %c0_i32_0 : i32, i32, i32
  }
}

module attributes {stable_mosaic.version = 11 : i64} {
  func.func @_norm_relu_kernel(%arg0: i32, %arg1: memref<32x256xbf16, #tpu.memory_space<vmem>>, %arg2: memref<32x1xf32, #tpu.memory_space<vmem>>, %arg3: memref<32x1xf32, #tpu.memory_space<vmem>>, %arg4: memref<32x256xbf16, #tpu.memory_space<vmem>>) attributes {dimension_semantics = [#tpu.dimension_semantics<parallel>], iteration_bounds = array<i64: 2>, scalar_prefetch = 0 : i64, scratch_operands = 0 : i64, tpu.core_type = #tpu.core_type<tc>, window_params = [{transform_indices = @transform_0, window_bounds = array<i64: 32, 256>}, {pipeline_mode = #tpu.pipeline_mode<synchronous>, transform_indices = @transform_1, window_bounds = array<i64: 32, 1>}, {pipeline_mode = #tpu.pipeline_mode<synchronous>, transform_indices = @transform_2, window_bounds = array<i64: 32, 1>}, {transform_indices = @transform_3, window_bounds = array<i64: 32, 256>}]} {
    %c0 = arith.constant 0 : index
    %c0_0 = arith.constant 0 : index
    %0 = vector.load %arg1[%c0, %c0_0] : memref<32x256xbf16, #tpu.memory_space<vmem>>, vector<32x256xbf16>
    %1 = arith.extf %0 : vector<32x256xbf16> to vector<32x256xf32>
    %c0_1 = arith.constant 0 : index
    %c0_2 = arith.constant 0 : index
    %2 = vector.load %arg2[%c0_1, %c0_2] : memref<32x1xf32, #tpu.memory_space<vmem>>, vector<32x1xf32>
    %3 = vector.broadcast %2 : vector<32x1xf32> to vector<32x256xf32>
    %4 = arith.subf %1, %3 : vector<32x256xf32>
    %c0_3 = arith.constant 0 : index
    %c0_4 = arith.constant 0 : index
    %5 = vector.load %arg3[%c0_3, %c0_4] : memref<32x1xf32, #tpu.memory_space<vmem>>, vector<32x1xf32>
    %6 = vector.broadcast %5 : vector<32x1xf32> to vector<32x256xf32>
    %7 = arith.mulf %4, %6 : vector<32x256xf32>
    %cst = arith.constant 0.000000e+00 : f32
    %8 = vector.broadcast %cst : f32 to vector<32x256xf32>
    %9 = arith.maximumf %7, %8 : vector<32x256xf32>
    %10 = arith.truncf %9 : vector<32x256xf32> to vector<32x256xbf16>
    %c0_5 = arith.constant 0 : index
    %c0_6 = arith.constant 0 : index
    %11 = vector.load %arg4[%c0_5, %c0_6] : memref<32x256xbf16, #tpu.memory_space<vmem>>, vector<32x256xbf16>
    tpu.vector_store %arg4[%c0_5, %c0_6], %10 {strides = array<i32>} : memref<32x256xbf16, #tpu.memory_space<vmem>>, vector<32x256xbf16>,
    return
  }
  func.func @transform_0(%arg0: i32) -> (i32, i32) {
    %c0_i32 = arith.constant 0 : i32
    %c0_i32_0 = arith.constant 0 : i32
    return %c0_i32, %arg0 : i32, i32
  }
  func.func @transform_1(%arg0: i32) -> (i32, i32) {
    %c0_i32 = arith.constant 0 : i32
    %c0_i32_0 = arith.constant 0 : i32
    %c0_i32_1 = arith.constant 0 : i32
    return %c0_i32, %c0_i32_0 : i32, i32
  }
  func.func @transform_2(%arg0: i32) -> (i32, i32) {
    %c0_i32 = arith.constant 0 : i32
    %c0_i32_0 = arith.constant 0 : i32
    %c0_i32_1 = arith.constant 0 : i32
    return %c0_i32, %c0_i32_0 : i32, i32
  }
  func.func @transform_3(%arg0: i32) -> (i32, i32) {
    %c0_i32 = arith.constant 0 : i32
    %c0_i32_0 = arith.constant 0 : i32
    return %c0_i32, %arg0 : i32, i32
  }
}

module attributes {stable_mosaic.version = 11 : i64} {
  func.func @_fused_mid_kernel(%arg0: i32, %arg1: i32, %arg2: memref<4x256xbf16, #tpu.memory_space<vmem>>, %arg3: memref<32x4xbf16, #tpu.memory_space<vmem>>, %arg4: memref<32x1xf32, #tpu.memory_space<vmem>>, %arg5: memref<32x1xf32, #tpu.memory_space<vmem>>, %arg6: memref<32x256xbf16, #tpu.memory_space<vmem>>, %arg7: memref<32x32xbf16, #tpu.memory_space<vmem>>, %arg8: memref<1x256xf32, #tpu.memory_space<vmem>>, %arg9: memref<32x256xbf16, #tpu.memory_space<vmem>>, %arg10: memref<1x32x1xf32, #tpu.memory_space<vmem>>, %arg11: memref<1x32x1xf32, #tpu.memory_space<vmem>>) attributes {dimension_semantics = [#tpu.dimension_semantics<parallel>, #tpu.dimension_semantics<arbitrary>], iteration_bounds = array<i64: 2, 1>, scalar_prefetch = 0 : i64, scratch_operands = 0 : i64, tpu.core_type = #tpu.core_type<tc>, window_params = [{transform_indices = @transform_0, window_bounds = array<i64: 4, 256>}, {pipeline_mode = #tpu.pipeline_mode<synchronous>, transform_indices = @transform_1, window_bounds = array<i64: 32, 4>}, {pipeline_mode = #tpu.pipeline_mode<synchronous>, transform_indices = @transform_2, window_bounds = array<i64: 32, 1>}, {pipeline_mode = #tpu.pipeline_mode<synchronous>, transform_indices = @transform_3, window_bounds = array<i64: 32, 1>}, {transform_indices = @transform_4, window_bounds = array<i64: 32, 256>}, {pipeline_mode = #tpu.pipeline_mode<synchronous>, transform_indices = @transform_5, window_bounds = array<i64: 32, 32>}, {transform_indices = @transform_6, window_bounds = array<i64: 1, 256>}, {transform_indices = @transform_7, window_bounds = array<i64: 32, 256>}, {transform_indices = @transform_8, window_bounds = array<i64: 1, 32, 1>}, {transform_indices = @transform_9, window_bounds = array<i64: 1, 32, 1>}]} {
    %c0 = arith.constant 0 : index
    %c0_0 = arith.constant 0 : index
    %0 = vector.load %arg3[%c0, %c0_0] : memref<32x4xbf16, #tpu.memory_space<vmem>>, vector<32x4xbf16>
    %c0_1 = arith.constant 0 : index
    %c0_2 = arith.constant 0 : index
    %1 = vector.load %arg2[%c0_1, %c0_2] : memref<4x256xbf16, #tpu.memory_space<vmem>>, vector<4x256xbf16>
    %cst = arith.constant dense<0.000000e+00> : vector<32x256xf32>
    %2 = tpu.matmul %0, %1, %cst {dimension_numbers = #tpu.dot_dimension_numbers<[1], [0], [0], [1], [0, 0, 1, 1], [], []>} : vector<32x4xbf16>, vector<4x256xbf16>, vector<32x256xf32> -> vector<32x256xf32>
    %c0_3 = arith.constant 0 : index
    %c0_4 = arith.constant 0 : index
    %3 = vector.load %arg6[%c0_3, %c0_4] : memref<32x256xbf16, #tpu.memory_space<vmem>>, vector<32x256xbf16>
    %4 = arith.extf %3 : vector<32x256xbf16> to vector<32x256xf32>
    %c0_5 = arith.constant 0 : index
    %c0_6 = arith.constant 0 : index
    %5 = vector.load %arg4[%c0_5, %c0_6] : memref<32x1xf32, #tpu.memory_space<vmem>>, vector<32x1xf32>
    %6 = vector.broadcast %5 : vector<32x1xf32> to vector<32x256xf32>
    %7 = arith.subf %2, %6 : vector<32x256xf32>
    %c0_7 = arith.constant 0 : index
    %c0_8 = arith.constant 0 : index
    %8 = vector.load %arg5[%c0_7, %c0_8] : memref<32x1xf32, #tpu.memory_space<vmem>>, vector<32x1xf32>
    %9 = vector.broadcast %8 : vector<32x1xf32> to vector<32x256xf32>
    %10 = arith.mulf %7, %9 : vector<32x256xf32>
    %11 = arith.addf %4, %10 : vector<32x256xf32>
    %c0_9 = arith.constant 0 : index
    %c0_10 = arith.constant 0 : index
    %12 = vector.load %arg7[%c0_9, %c0_10] : memref<32x32xbf16, #tpu.memory_space<vmem>>, vector<32x32xbf16>
    %13 = arith.truncf %11 : vector<32x256xf32> to vector<32x256xbf16>
    %cst_11 = arith.constant dense<0.000000e+00> : vector<32x256xf32>
    %14 = tpu.matmul %12, %13, %cst_11 {dimension_numbers = #tpu.dot_dimension_numbers<[1], [0], [0], [1], [0, 0, 1, 1], [], []>} : vector<32x32xbf16>, vector<32x256xbf16>, vector<32x256xf32> -> vector<32x256xf32>
    %c0_12 = arith.constant 0 : index
    %c0_13 = arith.constant 0 : index
    %15 = vector.load %arg8[%c0_12, %c0_13] : memref<1x256xf32, #tpu.memory_space<vmem>>, vector<1x256xf32>
    %16 = vector.broadcast %15 : vector<1x256xf32> to vector<32x256xf32>
    %17 = arith.mulf %14, %16 : vector<32x256xf32>
    %18 = arith.truncf %17 : vector<32x256xf32> to vector<32x256xbf16>
    %c0_14 = arith.constant 0 : index
    %c0_15 = arith.constant 0 : index
    %19 = vector.load %arg9[%c0_14, %c0_15] : memref<32x256xbf16, #tpu.memory_space<vmem>>, vector<32x256xbf16>
    tpu.vector_store %arg9[%c0_14, %c0_15], %18 {strides = array<i32>} : memref<32x256xbf16, #tpu.memory_space<vmem>>, vector<32x256xbf16>,
    %c0_i32 = arith.constant 0 : i32
    %20 = arith.cmpi eq, %arg1, %c0_i32 : i32
    %21 = arith.extui %20 : i1 to i32
    %c0_i32_16 = arith.constant 0 : i32
    %22 = arith.cmpi ne, %21, %c0_i32_16 : i32
    scf.if %22 {
      %cst_31 = arith.constant 0.000000e+00 : f32
      %40 = vector.broadcast %cst_31 : f32 to vector<32x1xf32>
      %c0_32 = arith.constant 0 : index
      %c0_33 = arith.constant 0 : index
      %c0_34 = arith.constant 0 : index
      %41 = vector.load %arg10[%c0_32, %c0_33, %c0_34] : memref<1x32x1xf32, #tpu.memory_space<vmem>>, vector<1x32x1xf32>
      %42 = vector.shape_cast %41 : vector<1x32x1xf32> to vector<32x1xf32>
      %43 = vector.shape_cast %40 : vector<32x1xf32> to vector<1x32x1xf32>
      tpu.vector_store %arg10[%c0_32, %c0_33, %c0_34], %43 {strides = array<i32>} : memref<1x32x1xf32, #tpu.memory_space<vmem>>, vector<1x32x1xf32>,
      %cst_35 = arith.constant 0.000000e+00 : f32
      %44 = vector.broadcast %cst_35 : f32 to vector<32x1xf32>
      %c0_36 = arith.constant 0 : index
      %c0_37 = arith.constant 0 : index
      %c0_38 = arith.constant 0 : index
      %45 = vector.load %arg11[%c0_36, %c0_37, %c0_38] : memref<1x32x1xf32, #tpu.memory_space<vmem>>, vector<1x32x1xf32>
      %46 = vector.shape_cast %45 : vector<1x32x1xf32> to vector<32x1xf32>
      %47 = vector.shape_cast %44 : vector<32x1xf32> to vector<1x32x1xf32>
      tpu.vector_store %arg11[%c0_36, %c0_37, %c0_38], %47 {strides = array<i32>} : memref<1x32x1xf32, #tpu.memory_space<vmem>>, vector<1x32x1xf32>,
    } else {
    }
    %c0_17 = arith.constant 0 : index
    %c0_18 = arith.constant 0 : index
    %c0_19 = arith.constant 0 : index
    %23 = vector.load %arg10[%c0_17, %c0_18, %c0_19] : memref<1x32x1xf32, #tpu.memory_space<vmem>>, vector<1x32x1xf32>
    %24 = vector.shape_cast %23 : vector<1x32x1xf32> to vector<32x1xf32>
    %cst_20 = arith.constant dense<0.000000e+00> : vector<32xf32>
    %25 = vector.multi_reduction <add>, %17, %cst_20 [1] : vector<32x256xf32> to vector<32xf32>
    %26 = vector.shape_cast %25 : vector<32xf32> to vector<32x1xf32>
    %27 = arith.addf %24, %26 : vector<32x1xf32>
    %c0_21 = arith.constant 0 : index
    %c0_22 = arith.constant 0 : index
    %c0_23 = arith.constant 0 : index
    %28 = vector.load %arg10[%c0_21, %c0_22, %c0_23] : memref<1x32x1xf32, #tpu.memory_space<vmem>>, vector<1x32x1xf32>
    %29 = vector.shape_cast %28 : vector<1x32x1xf32> to vector<32x1xf32>
    %30 = vector.shape_cast %27 : vector<32x1xf32> to vector<1x32x1xf32>
    tpu.vector_store %arg10[%c0_21, %c0_22, %c0_23], %30 {strides = array<i32>} : memref<1x32x1xf32, #tpu.memory_space<vmem>>, vector<1x32x1xf32>,
    %c0_24 = arith.constant 0 : index
    %c0_25 = arith.constant 0 : index
    %c0_26 = arith.constant 0 : index
    %31 = vector.load %arg11[%c0_24, %c0_25, %c0_26] : memref<1x32x1xf32, #tpu.memory_space<vmem>>, vector<1x32x1xf32>
    %32 = vector.shape_cast %31 : vector<1x32x1xf32> to vector<32x1xf32>
    %33 = arith.mulf %17, %17 : vector<32x256xf32>
    %cst_27 = arith.constant dense<0.000000e+00> : vector<32xf32>
    %34 = vector.multi_reduction <add>, %33, %cst_27 [1] : vector<32x256xf32> to vector<32xf32>
    %35 = vector.shape_cast %34 : vector<32xf32> to vector<32x1xf32>
    %36 = arith.addf %32, %35 : vector<32x1xf32>
    %c0_28 = arith.constant 0 : index
    %c0_29 = arith.constant 0 : index
    %c0_30 = arith.constant 0 : index
    %37 = vector.load %arg11[%c0_28, %c0_29, %c0_30] : memref<1x32x1xf32, #tpu.memory_space<vmem>>, vector<1x32x1xf32>
    %38 = vector.shape_cast %37 : vector<1x32x1xf32> to vector<32x1xf32>
    %39 = vector.shape_cast %36 : vector<32x1xf32> to vector<1x32x1xf32>
    tpu.vector_store %arg11[%c0_28, %c0_29, %c0_30], %39 {strides = array<i32>} : memref<1x32x1xf32, #tpu.memory_space<vmem>>, vector<1x32x1xf32>,
    return
  }
  func.func @transform_0(%arg0: i32, %arg1: i32) -> (i32, i32) {
    %c1_i32 = arith.constant 1 : i32
    %0 = arith.muli %arg0, %c1_i32 : i32
    %1 = arith.addi %0, %arg1 : i32
    %c0_i32 = arith.constant 0 : i32
    %c0_i32_0 = arith.constant 0 : i32
    return %c0_i32, %1 : i32, i32
  }
  func.func @transform_1(%arg0: i32, %arg1: i32) -> (i32, i32) {
    %c0_i32 = arith.constant 0 : i32
    %c0_i32_0 = arith.constant 0 : i32
    %c0_i32_1 = arith.constant 0 : i32
    return %c0_i32, %c0_i32_0 : i32, i32
  }
  func.func @transform_2(%arg0: i32, %arg1: i32) -> (i32, i32) {
    %c0_i32 = arith.constant 0 : i32
    %c0_i32_0 = arith.constant 0 : i32
    %c0_i32_1 = arith.constant 0 : i32
    return %c0_i32, %c0_i32_0 : i32, i32
  }
  func.func @transform_3(%arg0: i32, %arg1: i32) -> (i32, i32) {
    %c0_i32 = arith.constant 0 : i32
    %c0_i32_0 = arith.constant 0 : i32
    %c0_i32_1 = arith.constant 0 : i32
    return %c0_i32, %c0_i32_0 : i32, i32
  }
  func.func @transform_4(%arg0: i32, %arg1: i32) -> (i32, i32) {
    %c1_i32 = arith.constant 1 : i32
    %0 = arith.muli %arg0, %c1_i32 : i32
    %1 = arith.addi %0, %arg1 : i32
    %c0_i32 = arith.constant 0 : i32
    %c0_i32_0 = arith.constant 0 : i32
    return %c0_i32, %1 : i32, i32
  }
  func.func @transform_5(%arg0: i32, %arg1: i32) -> (i32, i32) {
    %c0_i32 = arith.constant 0 : i32
    %c0_i32_0 = arith.constant 0 : i32
    %c0_i32_1 = arith.constant 0 : i32
    return %c0_i32, %c0_i32_0 : i32, i32
  }
  func.func @transform_6(%arg0: i32, %arg1: i32) -> (i32, i32) {
    %c1_i32 = arith.constant 1 : i32
    %0 = arith.muli %arg0, %c1_i32 : i32
    %1 = arith.addi %0, %arg1 : i32
    %c0_i32 = arith.constant 0 : i32
    %c0_i32_0 = arith.constant 0 : i32
    return %c0_i32, %1 : i32, i32
  }
  func.func @transform_7(%arg0: i32, %arg1: i32) -> (i32, i32) {
    %c1_i32 = arith.constant 1 : i32
    %0 = arith.muli %arg0, %c1_i32 : i32
    %1 = arith.addi %0, %arg1 : i32
    %c0_i32 = arith.constant 0 : i32
    %c0_i32_0 = arith.constant 0 : i32
    return %c0_i32, %1 : i32, i32
  }
  func.func @transform_8(%arg0: i32, %arg1: i32) -> (i32, i32, i32) {
    %c0_i32 = arith.constant 0 : i32
    %c0_i32_0 = arith.constant 0 : i32
    %c0_i32_1 = arith.constant 0 : i32
    return %arg0, %c0_i32, %c0_i32_0 : i32, i32, i32
  }
  func.func @transform_9(%arg0: i32, %arg1: i32) -> (i32, i32, i32) {
    %c0_i32 = arith.constant 0 : i32
    %c0_i32_0 = arith.constant 0 : i32
    %c0_i32_1 = arith.constant 0 : i32
    return %arg0, %c0_i32, %c0_i32_0 : i32, i32, i32
  }
}

module attributes {stable_mosaic.version = 11 : i64} {
  func.func @_zeros_conv_kernel(%arg0: i32, %arg1: memref<288x256xbf16, #tpu.memory_space<vmem>>, %arg2: memref<8x288xbf16, #tpu.memory_space<vmem>>, %arg3: memref<8x1xf32, #tpu.memory_space<vmem>>, %arg4: memref<8x1xf32, #tpu.memory_space<vmem>>, %arg5: memref<8x256xf32, #tpu.memory_space<vmem>>) attributes {dimension_semantics = [#tpu.dimension_semantics<parallel>], iteration_bounds = array<i64: 2>, scalar_prefetch = 0 : i64, scratch_operands = 0 : i64, tpu.core_type = #tpu.core_type<tc>, window_params = [{transform_indices = @transform_0, window_bounds = array<i64: 288, 256>}, {pipeline_mode = #tpu.pipeline_mode<synchronous>, transform_indices = @transform_1, window_bounds = array<i64: 8, 288>}, {pipeline_mode = #tpu.pipeline_mode<synchronous>, transform_indices = @transform_2, window_bounds = array<i64: 8, 1>}, {pipeline_mode = #tpu.pipeline_mode<synchronous>, transform_indices = @transform_3, window_bounds = array<i64: 8, 1>}, {transform_indices = @transform_4, window_bounds = array<i64: 8, 256>}]} {
    %c0 = arith.constant 0 : index
    %c0_0 = arith.constant 0 : index
    %0 = vector.load %arg2[%c0, %c0_0] : memref<8x288xbf16, #tpu.memory_space<vmem>>, vector<8x288xbf16>
    %c0_1 = arith.constant 0 : index
    %c0_2 = arith.constant 0 : index
    %1 = vector.load %arg1[%c0_1, %c0_2] : memref<288x256xbf16, #tpu.memory_space<vmem>>, vector<288x256xbf16>
    %cst = arith.constant dense<0.000000e+00> : vector<8x256xf32>
    %2 = tpu.matmul %0, %1, %cst {dimension_numbers = #tpu.dot_dimension_numbers<[1], [0], [0], [1], [0, 0, 1, 1], [], []>} : vector<8x288xbf16>, vector<288x256xbf16>, vector<8x256xf32> -> vector<8x256xf32>
    %c0_3 = arith.constant 0 : index
    %c0_4 = arith.constant 0 : index
    %3 = vector.load %arg3[%c0_3, %c0_4] : memref<8x1xf32, #tpu.memory_space<vmem>>, vector<8x1xf32>
    %4 = vector.broadcast %3 : vector<8x1xf32> to vector<8x256xf32>
    %5 = arith.addf %2, %4 : vector<8x256xf32>
    %c0_5 = arith.constant 0 : index
    %c0_6 = arith.constant 0 : index
    %6 = vector.load %arg4[%c0_5, %c0_6] : memref<8x1xf32, #tpu.memory_space<vmem>>, vector<8x1xf32>
    %7 = vector.broadcast %6 : vector<8x1xf32> to vector<8x256xf32>
    %8 = arith.mulf %5, %7 : vector<8x256xf32>
    %c0_7 = arith.constant 0 : index
    %c0_8 = arith.constant 0 : index
    %9 = vector.load %arg5[%c0_7, %c0_8] : memref<8x256xf32, #tpu.memory_space<vmem>>, vector<8x256xf32>
    tpu.vector_store %arg5[%c0_7, %c0_8], %8 {strides = array<i32>} : memref<8x256xf32, #tpu.memory_space<vmem>>, vector<8x256xf32>,
    return
  }
  func.func @transform_0(%arg0: i32) -> (i32, i32) {
    %c0_i32 = arith.constant 0 : i32
    %c0_i32_0 = arith.constant 0 : i32
    return %c0_i32, %arg0 : i32, i32
  }
  func.func @transform_1(%arg0: i32) -> (i32, i32) {
    %c0_i32 = arith.constant 0 : i32
    %c0_i32_0 = arith.constant 0 : i32
    %c0_i32_1 = arith.constant 0 : i32
    return %c0_i32, %c0_i32_0 : i32, i32
  }
  func.func @transform_2(%arg0: i32) -> (i32, i32) {
    %c0_i32 = arith.constant 0 : i32
    %c0_i32_0 = arith.constant 0 : i32
    %c0_i32_1 = arith.constant 0 : i32
    return %c0_i32, %c0_i32_0 : i32, i32
  }
  func.func @transform_3(%arg0: i32) -> (i32, i32) {
    %c0_i32 = arith.constant 0 : i32
    %c0_i32_0 = arith.constant 0 : i32
    %c0_i32_1 = arith.constant 0 : i32
    return %c0_i32, %c0_i32_0 : i32, i32
  }
  func.func @transform_4(%arg0: i32) -> (i32, i32) {
    %c0_i32 = arith.constant 0 : i32
    %c0_i32_0 = arith.constant 0 : i32
    return %c0_i32, %arg0 : i32, i32
  }
}

</mosaic_0001>

<bundles_post_ra>
// kernel: nn_forward.7
= control target key start
LH: loop header
LB: loop body
LE: loop exit
PB: predicated region body
PF: predicated region fallthrough
CT: control target
= control target key end

     0   :  { %s680_s15 = smov 0   ;;  %s682_s16 = smov 0   ;;  %s777_s0 = inlined_call_operand.vmem [shape: bf16[36,512], index: 0, kind: input, shape index: {}]   ;;  %s778_s1 = inlined_call_operand.vmem [shape: bf16[4,36], index: 1, kind: input, shape index: {}]   ;;  %s779_s2 = inlined_call_operand.vmem [shape: bf16[4,512], index: 2, kind: output, shape index: {0}]   ;;  %s780_s3 = inlined_call_operand.vmem [shape: f32[2,4,1], index: 3, kind: output, shape index: {1}]   ;;  %s781_s4 = inlined_call_operand.vmem [shape: f32[2,4,1], index: 4, kind: output, shape index: {2}]  }
   0x1   :  { %s684_s17 = smov 0   ;;  %s686_s18 = smov 0  }
   0x2   :  { %s688_s19 = smov 0  }
   0x3 LB: > { %s27_s20 = sadd.s32 1, %s648_s18  ;;  %p43_p1 = scmp.ne.s32.totalorder %s640_s16, %s636_s15  ;;  %s652_s19 = sphi %s688_s19, %s15_s19   ;;  %s648_s18 = sphi %s686_s18, %s785_s18   ;;  %s644_s17 = sphi %s684_s17, %s784_s17   ;;  %s640_s16 = sphi %s682_s16, %s783_s16   ;;  %s636_s15 = sphi %s680_s15, %s782_s15  }
   0x4   : > { %p29_p0 = scmp.ge.s32.totalorder %s27_s20, 2  ;;  %p44_p2 = scmp.eq.s32.totalorder %s652_s19, 0 }
   0x5   : > { %s36_s22 = sadd.s32 1, %s640_s16  ;;  %p538_p5 = scmp.ge.s32.totalorder %s652_s19, 2 }
   0x6   : > { %s787_s20 = smov (%p29_p0, %s27_s20), 0  ;;  %p45_p3 = por %p44_p2, %p43_p1 }
   0x7   : > { %s33_s21 = ssub.s32 %s648_s18, %s787_s20  ;;  %173 = sbr.rel (%p538_p5) target bundleno = 21 (0x15), region = 20 }
   0x8   : > { %p34_p4 = scmp.eq.s32.totalorder %s33_s21, 0 }
   0xa   : > { %s715_s23 = scalar_select %p34_p4, %s640_s16, %s36_s22  }
   0xc   : > { %176 = sbr.rel (!%p45_p3) target bundleno = 21 (0x15), region = 24  ;;  %s178_s24 = sand.u32 (%p45_p3), 1, %s640_s16  }
   0xd   : > { %s566_s25 = sshll.u32 (%p45_p3), %s648_s18, 3  ;;  %s571_s26 = smul.u32 (%p45_p3), 40, %s178_s24 }
   0xe   : > { %s184_s29 = scalar_lea.vmem (%p45_p3), %s777_s0, %s566_s25 }
   0xf   : > { %v221_v0 = vld [vmem:[%s184_s29] sm:$0xff] (%p45_p3)  ;;  %v223_v1 = vld [vmem:[%s184_s29 + $0x10] sm:$0xff] (%p45_p3)  ;;  %s180_s30 = scalar_lea.vmem (%p45_p3), [#allocation2], %s571_s26 }
  0x10   : > { %v225_v2 = vld [vmem:[%s184_s29 + $0x20] sm:$0xff] (%p45_p3)  ;;  %222 = vst [vmem:[%s180_s30] sm:$0xff] (%p45_p3), %v221_v0  ;;  %v227_v3 = vld [vmem:[%s184_s29 + $0x30] sm:$0xff] (%p45_p3) }
  0x11   : > { %224 = vst [vmem:[%s180_s30 + $0x8] sm:$0xff] %v223_v1  ;;  %v229_v4 = vld [vmem:[%s184_s29 + $0x40] sm:$0xff] }
  0x12   : > { %226 = vst [vmem:[%s180_s30 + $0x10] sm:$0xff] %v225_v2 }
  0x13   : > { %228 = vst [vmem:[%s180_s30 + $0x18] sm:$0xff] %v227_v3 }
  0x14   : > { %230 = vst [vmem:[%s180_s30 + $0x20] sm:$0xff] %v229_v4 }
  0x15 PF: > { %p541_p6 = scmp.ge.s32.totalorder %s652_s19, 1  ;;  %p235_p7 = scmp.lt.s32.totalorder %s652_s19, 3 }
  0x17   : > { %p236_p8 = pnand %p541_p6, %p235_p7 }
  0x18   : > { %s242_s5 = sand.u32 (!%p236_p8), 1, %s636_s15   ;;  %p286_p9 = scmp.lt.s32.totalorder (!%p236_p8), %s644_s17, 1 }
  0x19   : > { %239 = sbr.rel (%p236_p8) target bundleno = 303 (0x12f), region = 62  ;;  %s542_s15 = sshll.u32 (!%p236_p8), %s644_s17, 1 }
  0x1a   : > { %s572_s6 = smul.u32 (!%p236_p8), 40, %s242_s5  ;;  %p280_p10 = scmp.lt.s32.totalorder (!%p236_p8), %s542_s15, 3 }
  0x1c   : > { %s244_s7 = scalar_lea.vmem (!%p236_p8), [#allocation2], %s572_s6 }
  0x1e   : > { %v300_v5 = vld [vmem:[%s244_s7 + $0x20] sm:$0x33]  ;;  %vm330_vm0 = vcmask 1041408   ;;  %v556_v8 = vld [vmem:[%s244_s7 + $0x10] sm:$0xf]  ;;  %vm326_vm1 = vcmask 293888  }
  0x1f   : > { %v314_v6 = vunpack.c.l.b16 %v300_v5  ;;  %v315_v7 = vunpack.c.h.b16 %v300_v5  ;;  %v570_v11 = vld [vmem:[%s244_s7 + $0x14] sm:$0xf0]  ;;  %v569_v12 = vld [vmem:[%s244_s7 + $0x14] sm:$0xf]  ;;  %v558_v13 = vld [vmem:[%s244_s7 + $0x18] sm:$0xf0] }
  0x20   : > { %v557_v16 = vor.u32 %v570_v11, %v556_v8  ;;  %v561_v17 = vor.u32 %v569_v12, %v558_v13  ;;  %v548_v18 = vld [vmem:[%s244_s7] sm:$0xf]  ;;  %v568_v19 = vld [vmem:[%s244_s7 + $0x4] sm:$0xf0]  ;;  %v567_v20 = vld [vmem:[%s244_s7 + $0x4] sm:$0xf] }
  0x21   : > { %v320_v9 = vpack.c.b16 %v314_v6, %v314_v6  ;;  %v321_v10 = vpack.c.b16 %v315_v7, %v315_v7  ;;  %v550_v21 = vld [vmem:[%s244_s7 + $0x8] sm:$0xf0]  ;;  %v549_v22 = vor.u32 %v568_v19, %v548_v18  ;;  %v295_v24 = vld [vmem:[%s778_s1] sm:$0x3]  ;;  %s287_s10 = scalar_select %p286_p9, %s644_s17, 1  ;;  %vm375_vm2 = vcmask 3072  }
  0x22   : > { %v553_v23 = vor.u32 %v567_v20, %v550_v21  ;;  %v654_v25 = vmov 0.0   ;;  %s789_s15 = smov (!%p280_p10, %s542_s15), 3  ;;  %vm379_vm3 = vcmask 1043456  }
  0x23   : > { %v332_v14 = vsel %vm330_vm0, %v320_v9, 0  ;;  %v335_v15 = vsel %vm330_vm0, %v321_v10, 0  ;;  %s544_s11 = sshll.u32 %s287_s10, 2  ;;  %s543_s25 = sshll.u32 %s789_s15, 1 }
  0x24   : > { %342 = vmatpush.bf16.msra.mxu0 %v332_v14  ;;  %355 = vmatpush.bf16.msra.mxu1 %v335_v15  ;;  %s736_s14 = scalar_lea.vmem %s780_s3, %s544_s11  ;;  %s744_s24 = scalar_lea.vmem %s781_s4, %s544_s11 }
  0x25   : > { %376 = vst.msk [vmem:[%s736_s14] sm:$0xf] %vm375_vm2, %v654_v25  ;;  %s283_s27 = scalar_lea.vmem %s779_s2, %s543_s25 }
  0x26   : > { %377 = vst.msk [vmem:[%s744_s24] sm:$0xf] %vm375_vm2, %v654_v25 }
  0x28   : > { %343 = vmatpush.bf16.msra.mxu0 %v557_v16  ;;  %356 = vmatpush.bf16.msra.mxu1 %v561_v17 }
  0x2c   : > { %344 = vmatpush.bf16.msra.mxu0 %v549_v22  ;;  %357 = vmatpush.bf16.msra.mxu1 %v553_v23  ;;  %v378_v41 = vld [vmem:[%s736_s14] sm:$0xf] }
  0x2d   : > { %v388_v44 = vld [vmem:[%s744_s24] sm:$0xf] }
  0x2f   : > { %562 = vmatmul.msk.bf16.vlgmr.msra.gmra.mxu0 %vm326_vm1, %v295_v24  ;;  %563 = vmatmul.msk.bf16.vlgmr.msra.gmra.mxu1 %vm326_vm1, %v295_v24 }
  0xac   : > { %v346_v26 = vpop.f32.mrf.mxu0  ;;  %v359_v27 = vpop.f32.mrf.mxu1 }
  0xad   : > { %v363_v28 = vpack.c.bf16 %v359_v27, %v346_v26  ;;  %v380_v29 = vsel %vm379_vm3, %v346_v26, 0.0  ;;  %v381_v30 = vsel %vm379_vm3, %v359_v27, 0.0  ;;  %v389_v33 = vmul.f32 %v346_v26, %v346_v26 }
  0xae   : > { %v382_v32 = vadd.f32 %v381_v30, %v380_v29  ;;  %v390_v34 = vmul.f32 %v359_v27, %v359_v27 }
  0xaf   : > { %v365_v31 = vrot.slane %v363_v28, 2  ;;  %v391_v38 = vsel %vm379_vm3, %v389_v33, 0.0 }
  0xb0   : > { %383 = vadd.xlane.f32.xlu0 %v382_v32  ;;  %v392_v39 = vsel %vm379_vm3, %v390_v34, 0.0 }
  0xb1   : > { %v368_v35 = vsel %vm330_vm0, %v363_v28, %v365_v31  ;;  %v393_v40 = vadd.f32 %v392_v39, %v391_v38 }
  0xb2   : > { %370 = vst [vmem:[%s283_s27] sm:$0xf] %v368_v35 }
  0xb4   : > { %v348_v36 = vpop.f32.mrf.mxu0  ;;  %v361_v37 = vpop.f32.mrf.mxu1 }
  0xb8   : > { %394 = vadd.xlane.f32.xlu0 %v393_v40 }
 0x123   : > { %v384_v42 = vpop.xlane.xlu0 %383 }
 0x124   : > { %v385_v43 = vadd.f32 %v384_v42, %v378_v41 }
 0x126   : > { %387 = vst.msk [vmem:[%s736_s14] sm:$0xf] %vm375_vm2, %v385_v43 }
 0x12b   : > { %v395_v45 = vpop.xlane.xlu0 %394 }
 0x12c   : > { %v396_v46 = vadd.f32 %v395_v45, %v388_v44 }
 0x12e   : > { %397 = vst.msk [vmem:[%s744_s24] sm:$0xf] %vm375_vm2, %v396_v46 }
 0x12f PF: > { %s15_s19 = sadd.s32 1, %s652_s19   ;;  %s782_s15 = smov %s640_s16 }
 0x130   : > { %p12_p11 = scmp.ge.s32.totalorder %s15_s19, 4   ;;  %s783_s16 = smov %s715_s23 }
 0x131   : > { %s784_s17 = smov %s648_s18  ;;  %s785_s18 = smov %s787_s20 }
 0x132   :  { %14 = sbr.rel (!%p12_p11) target bundleno = 3 (0x3), region = 129 }

// kernel: nn_forward.8
= control target key start
LH: loop header
LB: loop body
LE: loop exit
PB: predicated region body
PF: predicated region fallthrough
CT: control target
= control target key end

     0   :  { %s392_s15 = smov 0   ;;  %s418_s0 = inlined_call_operand.vmem [shape: bf16[4,512], index: 0, kind: input, shape index: {}]   ;;  %s419_s1 = inlined_call_operand.vmem [shape: f32[4,1], index: 1, kind: input, shape index: {}]   ;;  %s420_s2 = inlined_call_operand.vmem [shape: f32[4,1], index: 2, kind: input, shape index: {}]   ;;  %s421_s3 = inlined_call_operand.vmem [shape: bf16[4,512], index: 3, kind: input, shape index: {}]   ;;  %s422_s4 = inlined_call_operand.vmem [shape: bf16[4,512], index: 4, kind: output, shape index: {}]  }
   0x1 LB: > { %s333_s16 = sadd.s32 4294967295, %s363_s15   ;;  %p337_p0 = scmp.ge.s32.totalorder %s363_s15, 1  ;;  %s363_s15 = sphi %s392_s15, %s14_s15  }
   0x2   : > { %p174_p1 = scmp.lt.s32.totalorder %s363_s15, 3 }
   0x4   : > { %p175_p2 = pnand %p337_p0, %p174_p1 }
   0x5   : > { %s338_s21 = sshll.u32 (!%p175_p2), %s333_s16, 1 }
   0x6   : > { %178 = sbr.rel (%p175_p2) target bundleno = 156 (0x9c), region = 36  ;;  %p206_p3 = scmp.lt.s32.totalorder (!%p175_p2), %s338_s21, 3 }
   0xb   : > { %v227_v0 = vld [vmem:[%s419_s1] sm:$0xf]  ;;  %v365_v1 = vmov 0   ;;  %s424_s21 = smov (!%p206_p3, %s338_s21), 3  ;;  %v366_v3 = vmov 839922192  }
   0xc   : > { %356 = vset.pattern.permute.xlu0 %v365_v1  ;;  %v238_v2 = vld [vmem:[%s420_s2] sm:$0xf]  ;;  %s339_s22 = sshll.u32 %s424_s21, 1  ;;  %v233_v4 = vunpack.c.l.s4 %v366_v3  ;;  %vm259_vm0 = vcmask 1041408  }
   0xd   : > { %230 = vperm.xlu0 %356, %v227_v0   ;;  %s209_s25 = scalar_lea.vmem %s418_s0, %s339_s22  ;;  %s215_s28 = scalar_lea.vmem %s421_s3, %s339_s22 }
   0xe   : > { %v234_v6 = vunpack.c.0.s8 %v233_v4  ;;  %v223_v7 = vld [vmem:[%s209_s25] sm:$0xf]  ;;  %s221_s5 = scalar_lea.vmem %s422_s4, %s339_s22 }
   0xf   : > { %v224_v8 = vunpack.c.l.bf16 %v223_v7  ;;  %v225_v10 = vld [vmem:[%s215_s28] sm:$0xf] }
  0x10   : > { %v226_v13 = vunpack.c.l.bf16 %v225_v10 }
  0x15   : > { %241 = vperm.xlu0 %356, %v238_v2  }
  0x7f   : > { %v231_v5 = vpop.permute.xlu0 %230 }
  0x80   : > { %v235_v9 = vperm.slane %v231_v5, %v234_v6 }
  0x82   : > { %v237_v12 = vsub.f32 %v224_v8, %v235_v9 }
  0x87   : > { %v242_v11 = vpop.permute.xlu0 %241 }
  0x88   : > { %v246_v14 = vperm.slane %v242_v11, %v234_v6 }
  0x8a   : > { %v248_v15 = vmul.f32 %v246_v14, %v237_v12 }
  0x8c   : > { %v249_v16 = vadd.f32 %v248_v15, %v226_v13 }
  0x8e   : > { %251 = vst [vmem:[#allocation1] ss:$2 sm:$0xff] %v249_v16 }
  0x95   : > { %v252_v17 = vld.sshfl [vmem:[#allocation1] sm:$0xff pattern:$0x75316420]  ;;  %v253_v18 = vld.sshfl [vmem:[#allocation1 + $0x8] sm:$0xff pattern:$0x75316420] }
  0x96   : > { %v256_v19 = vpack.c.bf16 %v253_v18, %v252_v17 }
  0x98   : > { %v258_v20 = vrot.slane %v256_v19, 2 }
  0x9a   : > { %v262_v21 = vsel %vm259_vm0, %v256_v19, %v258_v20 }
  0x9b   : > { %264 = vst [vmem:[%s221_s5] sm:$0xf] %v262_v21 }
  0x9c PF: > { %s14_s15 = sadd.s32 1, %s363_s15  }
  0x9d   : > { %p11_p4 = scmp.ge.s32.totalorder %s14_s15, 4  }
  0x9f   :  { %13 = sbr.rel (!%p11_p4) target bundleno = 1 (0x1), region = 69 }

// kernel: nn_forward.9
= control target key start
LH: loop header
LB: loop body
LE: loop exit
PB: predicated region body
PF: predicated region fallthrough
CT: control target
= control target key end

     0   :  { %s1231_s27 = smov 0   ;;  %s1233_s28 = smov 0   ;;  %s1455_s0 = inlined_call_operand.vmem [shape: bf16[36,512], index: 0, kind: input, shape index: {}]   ;;  %s1456_s1 = inlined_call_operand.vmem [shape: bf16[32,36], index: 1, kind: input, shape index: {}]   ;;  %s1457_s2 = inlined_call_operand.vmem [shape: bf16[4,512], index: 2, kind: input, shape index: {}]   ;;  %s1458_s3 = inlined_call_operand.vmem [shape: bf16[32,4], index: 3, kind: input, shape index: {}]   ;;  %s1459_s4 = inlined_call_operand.vmem [shape: bf16[32,512], index: 4, kind: output, shape index: {0}]   ;;  %s1460_s5 = inlined_call_operand.vmem [shape: f32[2,32,1], index: 5, kind: output, shape index: {1}]   ;;  %s1461_s6 = inlined_call_operand.vmem [shape: f32[2,32,1], index: 6, kind: output, shape index: {2}]   ;;  %s1462_s7 = inlined_call_operand.vmem [shape: f32[2,32,1], index: 7, kind: output, shape index: {3}]   ;;  %s1463_s8 = inlined_call_operand.vmem [shape: f32[2,32,1], index: 8, kind: output, shape index: {4}]  }
   0x1   :  { %s1235_s29 = smov 0   ;;  %s1237_s30 = smov 0  }
   0x2   :  { %s1239_s9 = smov 0  }
   0x3 LB: > { %s31_s10 = sadd.s32 1, %s1179_s30  ;;  %s1025_s11 = sadd.s32 4294967295, %s1183_s9   ;;  %s1183_s9 = sphi %s1239_s9, %s19_s9   ;;  %s1179_s30 = sphi %s1237_s30, %s1468_s30   ;;  %s1175_s29 = sphi %s1235_s29, %s1467_s29   ;;  %s1171_s28 = sphi %s1233_s28, %s1466_s28   ;;  %s1167_s27 = sphi %s1231_s27, %s1465_s27  }
   0x4   : > { %p33_p0 = scmp.ge.s32.totalorder %s31_s10, 2  ;;  %p47_p1 = scmp.ne.s32.totalorder %s1171_s28, %s1167_s27 }
   0x5   : > { %p48_p2 = scmp.eq.s32.totalorder %s1183_s9, 0  ;;  %p149_p4 = scmp.eq.s32.totalorder %s1025_s11, 1 }
   0x6   : > { %s1470_s10 = smov (%p33_p0, %s31_s10), 0  ;;  %s40_s13 = sadd.s32 1, %s1171_s28 }
   0x7   : > { %p49_p3 = por %p48_p2, %p47_p1  ;;  %s37_s12 = ssub.s32 %s1179_s30, %s1470_s10 }
   0x8   : > { %p38_p5 = scmp.eq.s32.totalorder %s37_s12, 0  ;;  %p1266_p6 = por %p149_p4, %p47_p1 }
   0x9   : > { %p1028_p7 = scmp.ge.s32.totalorder %s1183_s9, 2 }
   0xa   : > { %s1271_s15 = scalar_select %p38_p5, %s1171_s28, %s40_s13  }
   0xb   : > { %281 = sbr.rel (%p1028_p7) target bundleno = 25 (0x19), region = 24 }
  0x10   : > { %284 = sbr.rel (!%p49_p3) target bundleno = 25 (0x19), region = 28  ;;  %s286_s16 = sand.u32 (%p49_p3), 1, %s1171_s28  }
  0x11   : > { %s1088_s17 = sshll.u32 (%p49_p3), %s1179_s30, 3  ;;  %s1102_s18 = smul.u32 (%p49_p3), 40, %s286_s16 }
  0x12   : > { %s292_s21 = scalar_lea.vmem (%p49_p3), %s1455_s0, %s1088_s17 }
  0x13   : > { %v329_v0 = vld [vmem:[%s292_s21] sm:$0xff] (%p49_p3)  ;;  %v331_v1 = vld [vmem:[%s292_s21 + $0x10] sm:$0xff] (%p49_p3)  ;;  %s288_s22 = scalar_lea.vmem (%p49_p3), [#allocation2], %s1102_s18 }
  0x14   : > { %v333_v2 = vld [vmem:[%s292_s21 + $0x20] sm:$0xff] (%p49_p3)  ;;  %330 = vst [vmem:[%s288_s22] sm:$0xff] (%p49_p3), %v329_v0  ;;  %v335_v3 = vld [vmem:[%s292_s21 + $0x30] sm:$0xff] (%p49_p3) }
  0x15   : > { %332 = vst [vmem:[%s288_s22 + $0x8] sm:$0xff] %v331_v1  ;;  %v337_v4 = vld [vmem:[%s292_s21 + $0x40] sm:$0xff] }
  0x16   : > { %334 = vst [vmem:[%s288_s22 + $0x10] sm:$0xff] %v333_v2 }
  0x17   : > { %336 = vst [vmem:[%s288_s22 + $0x18] sm:$0xff] %v335_v3 }
  0x18   : > { %338 = vst [vmem:[%s288_s22 + $0x20] sm:$0xff] %v337_v4 }
  0x19 PF: > { %p1031_p8 = scmp.ge.s32.totalorder %s1183_s9, 1  ;;  %p354_p9 = scmp.lt.s32.totalorder %s1183_s9, 3 }
  0x1b   : > { %p355_p10 = pnand %p1031_p8, %p354_p9 }
  0x1c   : > { %s361_s23 = sand.u32 (!%p355_p10), 1, %s1167_s27   ;;  %s1033_s24 = sshll.u32 (!%p355_p10), %s1175_s29, 1 }
  0x1d   : > { %358 = sbr.rel (%p355_p10) target bundleno = 346 (0x15a), region = 70  ;;  %p423_p11 = scmp.lt.s32.totalorder (!%p355_p10), %s1033_s24, 3 }
  0x1e   : > { %s1103_s25 = smul.u32 (!%p355_p10), 40, %s361_s23  ;;  %p431_p12 = scmp.lt.s32.totalorder (!%p355_p10), %s1175_s29, 1 }
  0x20   : > { %s363_s26 = scalar_lea.vmem (!%p355_p10), [#allocation2], %s1103_s25 }
  0x22   : > { %v460_v5 = vld [vmem:[%s363_s26 + $0x20] sm:$0x33]  ;;  %s1472_s24 = smov (!%p423_p11, %s1033_s24), 3  ;;  %vm503_vm0 = vcmask 1041408   ;;  %v1061_v8 = vld [vmem:[%s363_s26 + $0x10] sm:$0xf] }
  0x23   : > { %v484_v6 = vunpack.c.l.b16 %v460_v5  ;;  %v485_v7 = vunpack.c.h.b16 %v460_v5  ;;  %v1098_v9 = vld [vmem:[%s363_s26 + $0x14] sm:$0xf0]  ;;  %v1097_v12 = vld [vmem:[%s363_s26 + $0x14] sm:$0xf]  ;;  %v1063_v13 = vld [vmem:[%s363_s26 + $0x18] sm:$0xf0] }
  0x24   : > { %s1034_s11 = sshll.u32 %s1472_s24, 1  ;;  %v1062_v17 = vor.u32 %v1098_v9, %v1061_v8  ;;  %v1066_v18 = vor.u32 %v1097_v12, %v1063_v13  ;;  %v1053_v19 = vld [vmem:[%s363_s26] sm:$0xf]  ;;  %v1096_v20 = vld [vmem:[%s363_s26 + $0x4] sm:$0xf0]  ;;  %v1093_v25 = vld [vmem:[%s1456_s1] sm:$0xff] }
  0x25   : > { %v490_v10 = vpack.c.b16 %v484_v6, %v484_v6  ;;  %v491_v11 = vpack.c.b16 %v485_v7, %v485_v7  ;;  %s426_s16 = scalar_lea.vmem %s1457_s2, %s1034_s11  ;;  %v1095_v21 = vld [vmem:[%s363_s26 + $0x4] sm:$0xf]  ;;  %v1055_v22 = vld [vmem:[%s363_s26 + $0x8] sm:$0xf0]  ;;  %v1054_v23 = vor.u32 %v1096_v20, %v1053_v19  ;;  %v1099_v30 = vld [vmem:[%s1458_s3] sm:$0xff]  ;;  %vm496_vm1 = vcmask 293888  }
  0x26   : > { %v560_v16 = vld [vmem:[%s426_s16] sm:$0xf]  ;;  %v1058_v24 = vor.u32 %v1095_v21, %v1055_v22  ;;  %vm575_vm2 = vcmask 31744   ;;  %v1094_v31 = vld [vmem:[%s1456_s1 + $0x8] sm:$0xff]  ;;  %s1032_s26 = sshll.u32 %s361_s23, 5  ;;  %vm628_vm3 = vcmask 7168  }
  0x27   : > { %v505_v14 = vsel %vm503_vm0, %v490_v10, 0  ;;  %v508_v15 = vsel %vm503_vm0, %v491_v11, 0  ;;  %572 = vst [vmem:[#allocation1] ss:$4 sm:$0xff] %v560_v16  ;;  %v1100_v32 = vld [vmem:[%s1458_s3 + $0x8] sm:$0xff]  ;;  %s1306_s11 = scalar_lea.vmem [#allocation3], %s1032_s26 }
  0x28   : > { %515 = vmatpush.bf16.msra.mxu0 %v505_v14  ;;  %534 = vmatpush.bf16.msra.mxu1 %v508_v15  ;;  %s432_s27 = scalar_select %p431_p12, %s1175_s29, 1  ;;  %v1185_v59 = vmov 0.0  }
  0x2a   : > { %s1312_s23 = sshll.u32 %s432_s27, 5  ;;  %s1101_s27 = sshll.u32 (%p1266_p6), %s1175_s29, 3 }
  0x2b   : > { %s1322_s16 = scalar_lea.vmem %s1460_s5, %s1312_s23  ;;  %s1333_s19 = scalar_lea.vmem %s1461_s6, %s1312_s23 }
  0x2c   : > { %516 = vmatpush.bf16.msra.mxu0 %v1062_v17  ;;  %535 = vmatpush.bf16.msra.mxu1 %v1066_v18  ;;  %629 = vst.msk [vmem:[%s1322_s16] sm:$0xff] %vm628_vm3, %v1185_v59  ;;  %s1351_s22 = scalar_lea.vmem %s1463_s8, %s1312_s23  ;;  %s1364_s26 = scalar_lea.vmem %s1462_s7, %s1312_s23 }
  0x2d   : > { %630 = vst.msk [vmem:[%s1322_s16 + $0x8] sm:$0xff] %vm628_vm3, %v1185_v59  ;;  %s788_s13 = scalar_lea.vmem (%p1266_p6), %s1459_s4, %s1101_s27 }
  0x2e   : > { %v573_v26 = vld.sshfl [vmem:[#allocation1] sm:$0xff pattern:$0x73625140]  ;;  %v574_v27 = vld.sshfl [vmem:[#allocation1 + $0x8] sm:$0xff pattern:$0x73625140] }
  0x2f   : > { %v582_v28 = vsel %vm503_vm0, %v573_v26, 0  ;;  %v584_v29 = vsel %vm503_vm0, %v574_v27, 0  ;;  %631 = vst.msk [vmem:[%s1322_s16 + $0x10] sm:$0xff] %vm628_vm3, %v1185_v59 }
  0x30   : > { %517 = vmatpush.bf16.msra.mxu0 %v1054_v23  ;;  %536 = vmatpush.bf16.msra.mxu1 %v1058_v24  ;;  %632 = vst.msk [vmem:[%s1322_s16 + $0x18] sm:$0xff] %vm628_vm3, %v1185_v59 }
  0x31   : > { %593 = vmatpush.bf16.msra.mxu2 %v582_v28  ;;  %612 = vmatpush.bf16.msra.mxu3 %v584_v29  ;;  %633 = vst.msk [vmem:[%s1333_s19] sm:$0xff] %vm628_vm3, %v1185_v59 }
  0x32   : > { %634 = vst.msk [vmem:[%s1333_s19 + $0x8] sm:$0xff] %vm628_vm3, %v1185_v59 }
  0x33   : > { %1067 = vmatmul.msk.bf16.vlgmr.msra.gmra.mxu0 %vm496_vm1, %v1093_v25  ;;  %1069 = vmatmul.msk.bf16.vlgmr.msra.gmra.mxu1 %vm496_vm1, %v1093_v25  ;;  %635 = vst.msk [vmem:[%s1333_s19 + $0x10] sm:$0xff] %vm628_vm3, %v1185_v59  ;;  %v645_v22 = vld [vmem:[%s1322_s16] sm:$0xff] }
  0x34   : > { %1079 = vmatmul.msk.bf16.vlgmr.msra.gmra.mxu2 %vm575_vm2, %v1099_v30  ;;  %1081 = vmatmul.msk.bf16.vlgmr.msra.gmra.mxu3 %vm575_vm2, %v1099_v30  ;;  %636 = vst.msk [vmem:[%s1333_s19 + $0x18] sm:$0xff] %vm628_vm3, %v1185_v59 }
  0x35   : > { %641 = vst.msk [vmem:[%s1351_s22] sm:$0xff] %vm628_vm3, %v1185_v59 }
  0x36   : > { %642 = vst.msk [vmem:[%s1351_s22 + $0x8] sm:$0xff] %vm628_vm3, %v1185_v59 }
  0x37   : > { %643 = vst.msk [vmem:[%s1351_s22 + $0x10] sm:$0xff] %vm628_vm3, %v1185_v59 }
  0x38   : > { %644 = vst.msk [vmem:[%s1351_s22 + $0x18] sm:$0xff] %vm628_vm3, %v1185_v59  ;;  %v670_v24 = vld [vmem:[%s1333_s19] sm:$0xff] }
  0x39   : > { %637 = vst.msk [vmem:[%s1364_s26] sm:$0xff] %vm628_vm3, %v1185_v59 }
  0x3a   : > { %638 = vst.msk [vmem:[%s1364_s26 + $0x8] sm:$0xff] %vm628_vm3, %v1185_v59 }
  0x3b   : > { %639 = vst.msk [vmem:[%s1364_s26 + $0x10] sm:$0xff] %vm628_vm3, %v1185_v59 }
  0x3c   : > { %640 = vst.msk [vmem:[%s1364_s26 + $0x18] sm:$0xff] %vm628_vm3, %v1185_v59  ;;  %v726_v28 = vld [vmem:[%s1351_s22] sm:$0xff]  ;;  %v673_v59 = vld [vmem:[%s1333_s19 + $0x18] sm:$0xff] }
  0x40   : > { %v702_v29 = vld [vmem:[%s1364_s26] sm:$0xff] }
  0x43   : > { %1068 = vmatmul.msk.bf16.gmra.mxu0 %vm496_vm1, %v1094_v31  ;;  %1070 = vmatmul.msk.bf16.gmra.mxu1 %vm496_vm1, %v1094_v31 }
  0x44   : > { %1080 = vmatmul.msk.bf16.gmra.mxu2 %vm575_vm2, %v1100_v32  ;;  %1082 = vmatmul.msk.bf16.gmra.mxu3 %vm575_vm2, %v1100_v32 }
  0xb0   : > { %v519_v33 = vpop.f32.mrf.mxu0  ;;  %v538_v34 = vpop.f32.mrf.mxu1 }
  0xb1   : > { %v548_v35 = vpack.c.bf16 %v538_v34, %v519_v33  ;;  %v649_v36 = vadd.f32 %v538_v34, %v519_v33  ;;  %v674_v37 = vmul.f32 %v519_v33, %v519_v33  ;;  %v675_v38 = vmul.f32 %v538_v34, %v538_v34  ;;  %v647_v34 = vld [vmem:[%s1322_s16 + $0x10] sm:$0xff] }
  0xb3   : > { %552 = vst [vmem:[%s1306_s11] sm:$0xff] %v548_v35  ;;  %650 = vadd.xlane.f32.xlu0 %v649_v36  ;;  %v682_v39 = vadd.f32 %v675_v38, %v674_v37  ;;  %v646_v35 = vld [vmem:[%s1322_s16 + $0x8] sm:$0xff] }
  0xb4   : > { %v671_v37 = vld [vmem:[%s1333_s19 + $0x8] sm:$0xff] }
  0xb5   : > { %683 = vadd.xlane.f32.xlu2 %v682_v39 }
  0xb7   : > { %v595_v40 = vpop.f32.mrf.mxu2  ;;  %v614_v41 = vpop.f32.mrf.mxu3 }
  0xb8   : > { %v730_v42 = vmul.f32 %v595_v40, %v595_v40  ;;  %v731_v43 = vmul.f32 %v614_v41, %v614_v41  ;;  %v521_v44 = vpop.f32.mrf.mxu0  ;;  %v540_v45 = vpop.f32.mrf.mxu1  ;;  %v706_v48 = vadd.f32 %v614_v41, %v595_v40 }
  0xb9   : > { %v549_v46 = vpack.c.bf16 %v540_v45, %v521_v44  ;;  %v676_v51 = vmul.f32 %v521_v44, %v521_v44  ;;  %v677_v52 = vmul.f32 %v540_v45, %v540_v45  ;;  %v652_v57 = vadd.f32 %v540_v45, %v521_v44  ;;  %v703_v44 = vld [vmem:[%s1364_s26 + $0x8] sm:$0xff] }
  0xba   : > { %v738_v47 = vadd.f32 %v731_v43, %v730_v42  ;;  %v704_v43 = vld [vmem:[%s1364_s26 + $0x10] sm:$0xff] }
  0xbb   : > { %553 = vst [vmem:[%s1306_s11 + $0x8] sm:$0xff] %v549_v46  ;;  %v685_v58 = vadd.f32 %v677_v52, %v676_v51  ;;  %v672_v52 = vld [vmem:[%s1333_s19 + $0x10] sm:$0xff] }
  0xbc   : > { %739 = vadd.xlane.f32.xlu0 %v738_v47 }
  0xbd   : > { %707 = vadd.xlane.f32.xlu2 %v706_v48 }
  0xbf   : > { %v1314_v49 = vpop.f32.mrf.mxu2  ;;  %v1316_v50 = vpop.f32.mrf.mxu3 }
  0xc0   : > { %v524_v53 = vpop.f32.mrf.mxu0  ;;  %v543_v54 = vpop.f32.mrf.mxu1  ;;  %v709_v2 = vadd.f32 %v1316_v50, %v1314_v49  ;;  %v732_v19 = vmul.f32 %v1314_v49, %v1314_v49  ;;  %v733_v20 = vmul.f32 %v1316_v50, %v1316_v50  ;;  %v705_v49 = vld [vmem:[%s1364_s26 + $0x18] sm:$0xff] }
  0xc1   : > { %v550_v55 = vpack.c.bf16 %v543_v54, %v524_v53  ;;  %v655_v56 = vadd.f32 %v543_v54, %v524_v53  ;;  %v678_v3 = vmul.f32 %v524_v53, %v524_v53  ;;  %v679_v4 = vmul.f32 %v543_v54, %v543_v54  ;;  %v648_v50 = vld [vmem:[%s1322_s16 + $0x18] sm:$0xff] }
  0xc2   : > { %v741_v21 = vadd.f32 %v733_v20, %v732_v19 }
  0xc3   : > { %554 = vst [vmem:[%s1306_s11 + $0x10] sm:$0xff] %v550_v55  ;;  %656 = vadd.xlane.f32.xlu1 %v655_v56  ;;  %v688_v9 = vadd.f32 %v679_v4, %v678_v3  ;;  %v727_v3 = vld [vmem:[%s1351_s22 + $0x8] sm:$0xff] }
  0xc4   : > { %653 = vadd.xlane.f32.xlu0 %v652_v57 }
  0xc5   : > { %686 = vadd.xlane.f32.xlu2 %v685_v58  ;;  %v728_v58 = vld [vmem:[%s1351_s22 + $0x10] sm:$0xff] }
  0xc7   : > { %v600_v60 = vpop.f32.mrf.mxu2  ;;  %v619_v61 = vpop.f32.mrf.mxu3 }
  0xc8   : > { %v526_v62 = vpop.f32.mrf.mxu0  ;;  %v545_v63 = vpop.f32.mrf.mxu1  ;;  %v712_v0 = vadd.f32 %v619_v61, %v600_v60  ;;  %v734_v10 = vmul.f32 %v600_v60, %v600_v60  ;;  %v735_v11 = vmul.f32 %v619_v61, %v619_v61  ;;  %v729_v61 = vld [vmem:[%s1351_s22 + $0x18] sm:$0xff] }
  0xc9   : > { %v551_v1 = vpack.c.bf16 %v545_v63, %v526_v62  ;;  %v658_v8 = vadd.f32 %v545_v63, %v526_v62  ;;  %v680_v12 = vmul.f32 %v526_v62, %v526_v62  ;;  %v681_v13 = vmul.f32 %v545_v63, %v545_v63 }
  0xca   : > { %v744_v16 = vadd.f32 %v735_v11, %v734_v10 }
  0xcb   : > { %555 = vst [vmem:[%s1306_s11 + $0x18] sm:$0xff] %v551_v1  ;;  %713 = vadd.xlane.f32.xlu1 %v712_v0  ;;  %v691_v17 = vadd.f32 %v681_v13, %v680_v12 }
  0xcc   : > { %710 = vadd.xlane.f32.xlu0 %v709_v2 }
  0xcf   : > { %v602_v5 = vpop.f32.mrf.mxu2  ;;  %v621_v6 = vpop.f32.mrf.mxu3 }
  0xd0   : > { %v715_v7 = vadd.f32 %v621_v6, %v602_v5  ;;  %v736_v14 = vmul.f32 %v602_v5, %v602_v5  ;;  %v737_v15 = vmul.f32 %v621_v6, %v621_v6  ;;  %v823_v6 = vld [vmem:[%s1306_s11] sm:$0xff] (%p1266_p6) }
  0xd1   : > { %824 = vst [vmem:[%s788_s13] sm:$0xff] (%p1266_p6), %v823_v6 }
  0xd2   : > { %716 = vadd.xlane.f32.xlu2 %v715_v7  ;;  %v747_v18 = vadd.f32 %v737_v15, %v736_v14  ;;  %v825_v7 = vld [vmem:[%s1306_s11 + $0x8] sm:$0xff] (%p1266_p6) }
  0xd3   : > { %659 = vadd.xlane.f32.xlu1 %v658_v8  ;;  %v827_v8 = vld [vmem:[%s1306_s11 + $0x10] sm:$0xff] (%p1266_p6)  ;;  %826 = vst [vmem:[%s788_s13 + $0x10] sm:$0xff] (%p1266_p6), %v825_v7 }
  0xd4   : > { %689 = vadd.xlane.f32.xlu0 %v688_v9  ;;  %v829_v9 = vld [vmem:[%s1306_s11 + $0x18] sm:$0xff] (%p1266_p6)  ;;  %828 = vst [vmem:[%s788_s13 + $0x20] sm:$0xff] (%p1266_p6), %v827_v8 }
  0xd5   : > { %830 = vst [vmem:[%s788_s13 + $0x30] sm:$0xff] (%p1266_p6), %v829_v9 }
  0xda   : > { %745 = vadd.xlane.f32.xlu2 %v744_v16 }
  0xdb   : > { %692 = vadd.xlane.f32.xlu1 %v691_v17 }
  0xdc   : > { %748 = vadd.xlane.f32.xlu0 %v747_v18 }
  0xe3   : > { %742 = vadd.xlane.f32.xlu1 %v741_v21 }
 0x126   : > { %v651_v23 = vpop.xlane.xlu0 %650 }
 0x127   : > { %v661_v25 = vadd.f32 %v651_v23, %v645_v22 }
 0x128   : > { %v684_v26 = vpop.xlane.xlu2 %683 }
 0x129   : > { %666 = vst.msk [vmem:[%s1322_s16] sm:$0xff] %vm628_vm3, %v661_v25  ;;  %v694_v27 = vadd.f32 %v684_v26, %v670_v24 }
 0x12b   : > { %698 = vst.msk [vmem:[%s1333_s19] sm:$0xff] %vm628_vm3, %v694_v27 }
 0x12f   : > { %v740_v30 = vpop.xlane.xlu0 %739 }
 0x130   : > { %v750_v31 = vadd.f32 %v740_v30, %v726_v28  ;;  %v708_v32 = vpop.xlane.xlu2 %707 }
 0x131   : > { %v718_v33 = vadd.f32 %v708_v32, %v702_v29 }
 0x132   : > { %754 = vst.msk [vmem:[%s1351_s22] sm:$0xff] %vm628_vm3, %v750_v31 }
 0x133   : > { %722 = vst.msk [vmem:[%s1364_s26] sm:$0xff] %vm628_vm3, %v718_v33 }
 0x136   : > { %v657_v36 = vpop.xlane.xlu1 %656 }
 0x137   : > { %v654_v38 = vpop.xlane.xlu0 %653  ;;  %v663_v39 = vadd.f32 %v657_v36, %v647_v34 }
 0x138   : > { %v662_v40 = vadd.f32 %v654_v38, %v646_v35  ;;  %v687_v41 = vpop.xlane.xlu2 %686 }
 0x139   : > { %668 = vst.msk [vmem:[%s1322_s16 + $0x10] sm:$0xff] %vm628_vm3, %v663_v39  ;;  %v695_v42 = vadd.f32 %v687_v41, %v671_v37 }
 0x13a   : > { %667 = vst.msk [vmem:[%s1322_s16 + $0x8] sm:$0xff] %vm628_vm3, %v662_v40 }
 0x13b   : > { %699 = vst.msk [vmem:[%s1333_s19 + $0x8] sm:$0xff] %vm628_vm3, %v695_v42 }
 0x13e   : > { %v714_v45 = vpop.xlane.xlu1 %713 }
 0x13f   : > { %v711_v46 = vpop.xlane.xlu0 %710  ;;  %v720_v47 = vadd.f32 %v714_v45, %v704_v43 }
 0x140   : > { %v719_v48 = vadd.f32 %v711_v46, %v703_v44 }
 0x141   : > { %724 = vst.msk [vmem:[%s1364_s26 + $0x10] sm:$0xff] %vm628_vm3, %v720_v47 }
 0x142   : > { %723 = vst.msk [vmem:[%s1364_s26 + $0x8] sm:$0xff] %vm628_vm3, %v719_v48 }
 0x145   : > { %v717_v51 = vpop.xlane.xlu2 %716 }
 0x146   : > { %v721_v53 = vadd.f32 %v717_v51, %v705_v49  ;;  %v660_v54 = vpop.xlane.xlu1 %659 }
 0x147   : > { %v690_v55 = vpop.xlane.xlu0 %689  ;;  %v664_v56 = vadd.f32 %v660_v54, %v648_v50 }
 0x148   : > { %725 = vst.msk [vmem:[%s1364_s26 + $0x18] sm:$0xff] %vm628_vm3, %v721_v53  ;;  %v696_v57 = vadd.f32 %v690_v55, %v672_v52 }
 0x149   : > { %669 = vst.msk [vmem:[%s1322_s16 + $0x18] sm:$0xff] %vm628_vm3, %v664_v56 }
 0x14a   : > { %700 = vst.msk [vmem:[%s1333_s19 + $0x10] sm:$0xff] %vm628_vm3, %v696_v57 }
 0x14d   : > { %v746_v60 = vpop.xlane.xlu2 %745 }
 0x14e   : > { %v752_v62 = vadd.f32 %v746_v60, %v728_v58  ;;  %v693_v63 = vpop.xlane.xlu1 %692 }
 0x14f   : > { %v749_v0 = vpop.xlane.xlu0 %748  ;;  %v697_v1 = vadd.f32 %v693_v63, %v673_v59 }
 0x150   : > { %756 = vst.msk [vmem:[%s1351_s22 + $0x10] sm:$0xff] %vm628_vm3, %v752_v62  ;;  %v753_v2 = vadd.f32 %v749_v0, %v729_v61 }
 0x151   : > { %701 = vst.msk [vmem:[%s1333_s19 + $0x18] sm:$0xff] %vm628_vm3, %v697_v1 }
 0x152   : > { %757 = vst.msk [vmem:[%s1351_s22 + $0x18] sm:$0xff] %vm628_vm3, %v753_v2 }
 0x155   : > { %784 = sbr.rel (!%p1266_p6) target bundleno = 346 (0x15a), region = 82 }
 0x156   : > { %v743_v4 = vpop.xlane.xlu1 %742 }
 0x157   : > { %v751_v5 = vadd.f32 %v743_v4, %v727_v3 }
 0x159   : > { %755 = vst.msk [vmem:[%s1351_s22 + $0x8] sm:$0xff] %vm628_vm3, %v751_v5 }
 0x15a PF: > { %s19_s9 = sadd.s32 1, %s1183_s9   ;;  %s1465_s27 = smov %s1171_s28 }
 0x15b   : > { %p16_p13 = scmp.ge.s32.totalorder %s19_s9, 4   ;;  %s1466_s28 = smov %s1271_s15 }
 0x15c   : > { %s1467_s29 = smov %s1179_s30  ;;  %s1468_s30 = smov %s1470_s10 }
 0x15d   :  { %18 = sbr.rel (!%p16_p13) target bundleno = 3 (0x3), region = 202 }

// kernel: nn_forward.10
= control target key start
LH: loop header
LB: loop body
LE: loop exit
PB: predicated region body
PF: predicated region fallthrough
CT: control target
= control target key end

     0   :  { %s508_s12 = smov 0   ;;  %s510_s13 = smov 0   ;;  %s602_s0 = inlined_call_operand.vmem [shape: bf16[32,512], index: 0, kind: input, shape index: {}]   ;;  %s603_s1 = inlined_call_operand.vmem [shape: f32[32,1], index: 1, kind: input, shape index: {}]   ;;  %s604_s2 = inlined_call_operand.vmem [shape: f32[32,1], index: 2, kind: input, shape index: {}]   ;;  %s605_s3 = inlined_call_operand.vmem [shape: bf16[32,512], index: 3, kind: output, shape index: {}]  }
   0x1   :  { %s512_s14 = smov 0  }
   0x2 LB: > { %s418_s15 = sadd.s32 4294967295, %s485_s14   ;;  %s525_s16 = sadd.s32 1, %s485_s14   ;;  %s485_s14 = sphi %s512_s14, %s609_s14   ;;  %s481_s13 = sphi %s510_s13, %s608_s13   ;;  %s477_s12 = sphi %s508_s12, %s607_s12  }
   0x3   : > { %s17_s17 = ssub.s32 %s485_s14, %s525_s16  ;;  %s20_s18 = sadd.s32 1, %s481_s13 }
   0x4   : > { %p18_p0 = scmp.eq.s32.totalorder %s17_s17, 0  ;;  %p27_p1 = scmp.ne.s32.totalorder %s481_s13, %s477_s12 }
   0x5   : > { %p28_p2 = scmp.eq.s32.totalorder %s485_s14, 0  ;;  %p99_p3 = scmp.eq.s32.totalorder %s418_s15, 1 }
   0x6   : > { %s536_s19 = scalar_select %p18_p0, %s481_s13, %s20_s18  }
   0x7   : > { %p29_p4 = por %p28_p2, %p27_p1  ;;  %p538_p5 = por %p99_p3, %p27_p1 }
   0x8   : > { %p421_p6 = scmp.ge.s32.totalorder %s485_s14, 2 }
   0xa   : > { %127 = sbr.rel (%p421_p6) target bundleno = 23 (0x17), region = 24 }
   0xf   : > { %130 = sbr.rel (!%p29_p4) target bundleno = 23 (0x17), region = 28  ;;  %s132_s21 = sand.u32 (%p29_p4), 1, %s481_s13  }
  0x10   : > { %s433_s22 = sshll.u32 (%p29_p4), %s485_s14, 3  ;;  %s422_s23 = sshll.u32 (%p29_p4), %s132_s21, 5 }
  0x11   : > { %s137_s26 = scalar_lea.vmem (%p29_p4), %s602_s0, %s433_s22  ;;  %s134_s27 = scalar_lea.vmem (%p29_p4), [#allocation2], %s422_s23 }
  0x12   : > { %v172_v0 = vld [vmem:[%s137_s26] sm:$0xff] (%p29_p4)  ;;  %v174_v1 = vld [vmem:[%s137_s26 + $0x10] sm:$0xff] (%p29_p4) }
  0x13   : > { %v176_v2 = vld [vmem:[%s137_s26 + $0x20] sm:$0xff] (%p29_p4)  ;;  %173 = vst [vmem:[%s134_s27] sm:$0xff] (%p29_p4), %v172_v0  ;;  %v178_v3 = vld [vmem:[%s137_s26 + $0x30] sm:$0xff] (%p29_p4) }
  0x14   : > { %175 = vst [vmem:[%s134_s27 + $0x8] sm:$0xff] %v174_v1 }
  0x15   : > { %177 = vst [vmem:[%s134_s27 + $0x10] sm:$0xff] %v176_v2 }
  0x16   : > { %179 = vst [vmem:[%s134_s27 + $0x18] sm:$0xff] %v178_v3 }
  0x17 PF: > { %p425_p7 = scmp.ge.s32.totalorder %s485_s14, 1  ;;  %p184_p8 = scmp.lt.s32.totalorder %s485_s14, 3 }
  0x19   : > { %p185_p9 = pnand %p425_p7, %p184_p8 }
  0x1a   : > { %s191_s24 = sand.u32 (!%p185_p9), 1, %s477_s12  }
  0x1b   : > { %188 = sbr.rel (%p185_p9) target bundleno = 181 (0xb5), region = 66  ;;  %s426_s25 = sshll.u32 (!%p185_p9), %s191_s24, 5 }
  0x1c   : > { %s193_s26 = scalar_lea.vmem (!%p185_p9), [#allocation2], %s426_s25  ;;  %s575_s12 = scalar_lea.vmem (!%p185_p9), [#allocation3], %s426_s25 }
  0x20   : > { %v229_v4 = vld [vmem:[%s603_s1 + $0x10] sm:$0xff]  ;;  %v227_v5 = vld [vmem:[%s603_s1] sm:$0xff]  ;;  %v487_v6 = vmov 0   ;;  %v230_v8 = vld [vmem:[%s603_s1 + $0x18] sm:$0xff]  ;;  %s434_s27 = sshll.u32 (%p538_p5), %s418_s15, 3 }
  0x21   : > { %461 = vset.pattern.permute.xlu1 %v487_v6  ;;  %460 = vset.pattern.permute.xlu0 %v487_v6  ;;  %v259_v7 = vld [vmem:[%s604_s2] sm:$0xff]  ;;  %v228_v9 = vld [vmem:[%s603_s1 + $0x8] sm:$0xff]  ;;  %v262_v11 = vld [vmem:[%s604_s2 + $0x18] sm:$0xff]  ;;  %s316_s30 = scalar_lea.vmem (%p538_p5), %s605_s3, %s434_s27 }
  0x22   : > { %243 = vperm.xlu1 %461, %v229_v4   ;;  %233 = vperm.xlu0 %460, %v227_v5   ;;  %v260_v10 = vld [vmem:[%s604_s2 + $0x8] sm:$0xff]  ;;  %v261_v12 = vld [vmem:[%s604_s2 + $0x10] sm:$0xff]  ;;  %v215_v13 = vld [vmem:[%s193_s26] sm:$0xff] }
  0x23   : > { %462 = vset.pattern.permute.xlu2 %v487_v6  ;;  %v219_v14 = vunpack.c.l.bf16 %v215_v13  ;;  %v220_v15 = vunpack.c.h.bf16 %v215_v13  ;;  %v216_v21 = vld [vmem:[%s193_s26 + $0x8] sm:$0xff]  ;;  %v217_v28 = vld [vmem:[%s193_s26 + $0x10] sm:$0xff]  ;;  %v218_v31 = vld [vmem:[%s193_s26 + $0x18] sm:$0xff] }
  0x24   : > { %265 = vperm.xlu2 %462, %v259_v7   ;;  %v221_v26 = vunpack.c.l.bf16 %v216_v21  ;;  %v222_v27 = vunpack.c.h.bf16 %v216_v21  ;;  %v223_v35 = vunpack.c.l.bf16 %v217_v28  ;;  %v224_v36 = vunpack.c.h.bf16 %v217_v28 }
  0x25   : > { %v225_v38 = vunpack.c.l.bf16 %v218_v31  ;;  %v226_v39 = vunpack.c.h.bf16 %v218_v31 }
  0x2a   : > { %248 = vperm.xlu1 %461, %v230_v8   ;;  %238 = vperm.xlu0 %460, %v228_v9  }
  0x2c   : > { %270 = vperm.xlu2 %462, %v260_v10  }
  0x32   : > { %280 = vperm.xlu1 %461, %v262_v11   ;;  %275 = vperm.xlu0 %460, %v261_v12  }
  0x7e   : > { %v266_v16 = vpop.permute.xlu2 %265 }
  0x86   : > { %v271_v37 = vpop.permute.xlu2 %270 }
  0x94   : > { %v244_v17 = vpop.permute.xlu1 %243  ;;  %v234_v18 = vpop.permute.xlu0 %233 }
  0x95   : > { %v251_v19 = vsub.f32 %v219_v14, %v234_v18  ;;  %v252_v20 = vsub.f32 %v220_v15, %v234_v18  ;;  %v255_v44 = vsub.f32 %v223_v35, %v244_v17  ;;  %v256_v45 = vsub.f32 %v224_v36, %v244_v17 }
  0x97   : > { %v283_v22 = vmul.f32 %v266_v16, %v251_v19  ;;  %v284_v23 = vmul.f32 %v266_v16, %v252_v20 }
  0x99   : > { %v291_v24 = vmax.f32 %v283_v22, 0.0  ;;  %v292_v25 = vmax.f32 %v284_v23, 0.0 }
  0x9b   : > { %v299_v29 = vpack.c.bf16 %v292_v25, %v291_v24 }
  0x9c   : > { %v249_v30 = vpop.permute.xlu1 %248  ;;  %v239_v32 = vpop.permute.xlu0 %238 }
  0x9d   : > { %303 = vst [vmem:[%s575_s12] sm:$0xff] %v299_v29  ;;  %v253_v33 = vsub.f32 %v221_v26, %v239_v32  ;;  %v254_v34 = vsub.f32 %v222_v27, %v239_v32  ;;  %v257_v46 = vsub.f32 %v225_v38, %v249_v30  ;;  %v258_v47 = vsub.f32 %v226_v39, %v249_v30 }
  0x9f   : > { %v285_v40 = vmul.f32 %v271_v37, %v253_v33  ;;  %v286_v41 = vmul.f32 %v271_v37, %v254_v34 }
  0xa1   : > { %v293_v42 = vmax.f32 %v285_v40, 0.0  ;;  %v294_v43 = vmax.f32 %v286_v41, 0.0 }
  0xa3   : > { %v300_v48 = vpack.c.bf16 %v294_v43, %v293_v42 }
  0xa4   : > { %v281_v49 = vpop.permute.xlu1 %280  ;;  %v276_v50 = vpop.permute.xlu0 %275  ;;  %v351_v61 = vld [vmem:[%s575_s12] sm:$0xff] (%p538_p5) }
  0xa5   : > { %304 = vst [vmem:[%s575_s12 + $0x8] sm:$0xff] %v300_v48  ;;  %v289_v51 = vmul.f32 %v281_v49, %v257_v46  ;;  %v290_v52 = vmul.f32 %v281_v49, %v258_v47  ;;  %v287_v53 = vmul.f32 %v276_v50, %v255_v44  ;;  %v288_v54 = vmul.f32 %v276_v50, %v256_v45 }
  0xa6   : > { %352 = vst [vmem:[%s316_s30] sm:$0xff] (%p538_p5), %v351_v61 }
  0xa7   : > { %v297_v55 = vmax.f32 %v289_v51, 0.0  ;;  %v298_v56 = vmax.f32 %v290_v52, 0.0  ;;  %v295_v57 = vmax.f32 %v287_v53, 0.0  ;;  %v296_v58 = vmax.f32 %v288_v54, 0.0 }
  0xa8   : > { %313 = sbr.rel (!%p538_p5) target bundleno = 181 (0xb5), region = 74 }
  0xa9   : > { %v302_v59 = vpack.c.bf16 %v298_v56, %v297_v55  ;;  %v301_v60 = vpack.c.bf16 %v296_v58, %v295_v57 }
  0xab   : > { %306 = vst [vmem:[%s575_s12 + $0x18] sm:$0xff] %v302_v59 }
  0xac   : > { %305 = vst [vmem:[%s575_s12 + $0x10] sm:$0xff] %v301_v60  ;;  %v353_v62 = vld [vmem:[%s575_s12 + $0x8] sm:$0xff] (%p538_p5) }
  0xad   : > { %354 = vst [vmem:[%s316_s30 + $0x10] sm:$0xff] %v353_v62 }
  0xb2   : > { %v357_v0 = vld [vmem:[%s575_s12 + $0x18] sm:$0xff] }
  0xb3   : > { %v355_v63 = vld [vmem:[%s575_s12 + $0x10] sm:$0xff]  ;;  %358 = vst [vmem:[%s316_s30 + $0x30] sm:$0xff] %v357_v0 }
  0xb4   : > { %356 = vst [vmem:[%s316_s30 + $0x20] sm:$0xff] %v355_v63 }
  0xb5 PF: > { %p10_p10 = scmp.ge.s32.totalorder %s525_s16, 4   ;;  %s607_s12 = smov %s481_s13 }
  0xb6   : > { %s608_s13 = smov %s536_s19  ;;  %s609_s14 = smov %s525_s16 }
  0xb7   :  { %12 = sbr.rel (!%p10_p10) target bundleno = 2 (0x2), region = 143 }

// kernel: nn_forward.11
= control target key start
LH: loop header
LB: loop body
LE: loop exit
PB: predicated region body
PF: predicated region fallthrough
CT: control target
= control target key end

     0   :  { %s1186_s30 = smov 0   ;;  %s1188_s10 = smov 0   ;;  %s1371_s0 = inlined_call_operand.vmem [shape: bf16[4,512], index: 0, kind: input, shape index: {}]   ;;  %s1372_s1 = inlined_call_operand.vmem [shape: bf16[32,4], index: 1, kind: input, shape index: {}]   ;;  %s1373_s2 = inlined_call_operand.vmem [shape: f32[32,1], index: 2, kind: input, shape index: {}]   ;;  %s1374_s3 = inlined_call_operand.vmem [shape: f32[32,1], index: 3, kind: input, shape index: {}]   ;;  %s1375_s4 = inlined_call_operand.vmem [shape: bf16[32,512], index: 4, kind: input, shape index: {}]   ;;  %s1376_s5 = inlined_call_operand.vmem [shape: bf16[32,32], index: 5, kind: input, shape index: {}]   ;;  %s1377_s6 = inlined_call_operand.vmem [shape: f32[1,512], index: 6, kind: input, shape index: {}]   ;;  %s1378_s7 = inlined_call_operand.vmem [shape: bf16[32,512], index: 7, kind: output, shape index: {0}]   ;;  %s1379_s8 = inlined_call_operand.vmem [shape: f32[2,32,1], index: 8, kind: output, shape index: {1}]   ;;  %s1380_s9 = inlined_call_operand.vmem [shape: f32[2,32,1], index: 9, kind: output, shape index: {2}]  }
   0x1   :  { %s1190_s11 = smov 0   ;;  %s1192_s12 = smov 0  }
   0x2   :  { %s1194_s13 = smov 0  }
   0x3 LB: > { %s32_s14 = sadd.s32 1, %s1128_s12  ;;  %s995_s15 = sadd.s32 4294967295, %s1132_s13   ;;  %s1132_s13 = sphi %s1194_s13, %s20_s13   ;;  %s1128_s12 = sphi %s1192_s12, %s1385_s12   ;;  %s1124_s11 = sphi %s1190_s11, %s1384_s11   ;;  %s1120_s10 = sphi %s1188_s10, %s1383_s10   ;;  %s1116_s30 = sphi %s1186_s30, %s1382_s30  }
   0x4   : > { %p34_p0 = scmp.ge.s32.totalorder %s32_s14, 2  ;;  %p139_p1 = scmp.ne.s32.totalorder %s1120_s10, %s1116_s30 }
   0x5   : > { %p140_p2 = scmp.eq.s32.totalorder %s1132_s13, 0  ;;  %p220_p4 = scmp.eq.s32.totalorder %s995_s15, 1 }
   0x6   : > { %s1387_s14 = smov (%p34_p0, %s32_s14), 0  ;;  %s132_s17 = sadd.s32 1, %s1120_s10 }
   0x7   : > { %p141_p3 = por %p140_p2, %p139_p1  ;;  %s129_s16 = ssub.s32 %s1128_s12, %s1387_s14 }
   0x8   : > { %p130_p5 = scmp.eq.s32.totalorder %s129_s16, 0  ;;  %p1221_p6 = por %p220_p4, %p139_p1 }
   0x9   : > { %p998_p7 = scmp.ge.s32.totalorder %s1132_s13, 2 }
   0xa   : > { %s1226_s19 = scalar_select %p130_p5, %s1120_s10, %s132_s17  }
   0xb   : > { %306 = sbr.rel (%p998_p7) target bundleno = 24 (0x18), region = 32 }
  0x10   : > { %320 = sbr.rel (!%p141_p3) target bundleno = 24 (0x18), region = 40  ;;  %s322_s20 = sand.u32 (%p141_p3), 1, %s1120_s10  }
  0x11   : > { %s1041_s21 = sshll.u32 (%p141_p3), %s1128_s12, 3  ;;  %s999_s22 = sshll.u32 (%p141_p3), %s322_s20, 5 }
  0x12   : > { %s328_s25 = scalar_lea.vmem (%p141_p3), %s1375_s4, %s1041_s21  ;;  %s324_s26 = scalar_lea.vmem (%p141_p3), [#allocation2], %s999_s22 }
  0x13   : > { %v363_v0 = vld [vmem:[%s328_s25] sm:$0xff] (%p141_p3)  ;;  %v365_v1 = vld [vmem:[%s328_s25 + $0x10] sm:$0xff] (%p141_p3) }
  0x14   : > { %v367_v2 = vld [vmem:[%s328_s25 + $0x20] sm:$0xff] (%p141_p3)  ;;  %364 = vst [vmem:[%s324_s26] sm:$0xff] (%p141_p3), %v363_v0  ;;  %v369_v3 = vld [vmem:[%s328_s25 + $0x30] sm:$0xff] (%p141_p3) }
  0x15   : > { %366 = vst [vmem:[%s324_s26 + $0x8] sm:$0xff] %v365_v1 }
  0x16   : > { %368 = vst [vmem:[%s324_s26 + $0x10] sm:$0xff] %v367_v2 }
  0x17   : > { %370 = vst [vmem:[%s324_s26 + $0x18] sm:$0xff] %v369_v3 }
  0x18 PF: > { %p1002_p8 = scmp.ge.s32.totalorder %s1132_s13, 1  ;;  %p385_p9 = scmp.lt.s32.totalorder %s1132_s13, 3 }
  0x1a   : > { %p386_p10 = pnand %p1002_p8, %p385_p9 }
  0x1b   : > { %s1005_s29 = sshll.u32 (!%p386_p10), %s1124_s11, 1  ;;  %s392_s27 = sand.u32 (!%p386_p10), 1, %s1116_s30  }
  0x1c   : > { %389 = sbr.rel (%p386_p10) target bundleno = 501 (0x1f5), region = 82  ;;  %p449_p11 = scmp.lt.s32.totalorder (!%p386_p10), %s1005_s29, 3 }
  0x1d   : > { %s1274_s28 = sshll.u32 (!%p386_p10), %s392_s27, 5  ;;  %p466_p12 = scmp.lt.s32.totalorder (!%p386_p10), %s1124_s11, 1 }
  0x1e   : > { %s394_s15 = scalar_lea.vmem (!%p386_p10), [#allocation2], %s1274_s28 }
  0x21   : > { %v560_v4 = vld [vmem:[%s1373_s2 + $0x10] sm:$0xff]  ;;  %v1134_v5 = vmov 0   ;;  %s1389_s29 = smov (!%p449_p11, %s1005_s29), 3  ;;  %v558_v7 = vld [vmem:[%s1373_s2] sm:$0xff]  ;;  %v561_v9 = vld [vmem:[%s1373_s2 + $0x18] sm:$0xff]  ;;  %vm503_vm0 = vcmask 1041408  }
  0x22   : > { %1091 = vset.pattern.permute.xlu0 %v1134_v5  ;;  %1092 = vset.pattern.permute.xlu1 %v1134_v5  ;;  %v592_v6 = vld [vmem:[%s1374_s3 + $0x10] sm:$0xff]  ;;  %s1006_s21 = sshll.u32 %s1389_s29, 1  ;;  %v593_v10 = vld [vmem:[%s1374_s3 + $0x18] sm:$0xff]  ;;  %v559_v11 = vld [vmem:[%s1373_s2 + $0x8] sm:$0xff]  ;;  %vm496_vm1 = vcmask 31744   ;;  %vm648_vm2 = vcmask 261120   ;;  %s461_s23 = scalar_lea.vmem %s1377_s6, %s1389_s29 }
  0x23   : > { %574 = vperm.xlu0 %1091, %v560_v4   ;;  %606 = vperm.xlu1 %1092, %v592_v6   ;;  %s452_s24 = scalar_lea.vmem %s1371_s0, %s1006_s21  ;;  %v590_v12 = vld [vmem:[%s1374_s3] sm:$0xff]  ;;  %v591_v13 = vld [vmem:[%s1374_s3 + $0x8] sm:$0xff]  ;;  %v548_v32 = vld [vmem:[%s394_s15 + $0x10] sm:$0xff]  ;;  %s1295_s29 = scalar_lea.vmem [#allocation3], %s1274_s28  ;;  %vm719_vm3 = vcmask 7168  }
  0x24   : > { %1093 = vset.pattern.permute.xlu2 %v1134_v5  ;;  %v481_v8 = vld [vmem:[%s452_s24] sm:$0xf]  ;;  %v1045_v19 = vld [vmem:[%s1372_s1 + $0x8] sm:$0xff]  ;;  %v554_v39 = vunpack.c.l.bf16 %v548_v32  ;;  %v555_v40 = vunpack.c.h.bf16 %v548_v32  ;;  %v547_v41 = vld [vmem:[%s394_s15 + $0x8] sm:$0xff]  ;;  %s467_s24 = scalar_select %p466_p12, %s1124_s11, 1 }
  0x25   : > { %564 = vperm.xlu2 %1093, %v558_v7   ;;  %493 = vst [vmem:[#allocation1] ss:$4 sm:$0xff] %v481_v8  ;;  %v1044_v18 = vld [vmem:[%s1372_s1] sm:$0xff]  ;;  %v546_v53 = vld [vmem:[%s394_s15] sm:$0xff]  ;;  %v552_v54 = vunpack.c.l.bf16 %v547_v41  ;;  %v553_v55 = vunpack.c.h.bf16 %v547_v41  ;;  %s1048_s28 = sshll.u32 (%p1221_p6), %s1124_s11, 3 }
  0x26   : > { %v549_v35 = vld [vmem:[%s394_s15 + $0x18] sm:$0xff]  ;;  %v550_v62 = vunpack.c.l.bf16 %v546_v53  ;;  %v551_v63 = vunpack.c.h.bf16 %v546_v53  ;;  %s1042_s25 = sshll.u32 %s467_s24, 5  ;;  %s805_s22 = scalar_lea.vmem (%p1221_p6), %s1378_s7, %s1048_s28 }
  0x27   : > { %v556_v46 = vunpack.c.l.bf16 %v549_v35  ;;  %v557_v47 = vunpack.c.h.bf16 %v549_v35  ;;  %s1292_s15 = scalar_lea.vmem %s1379_s8, %s1042_s25  ;;  %s1305_s17 = scalar_lea.vmem %s1380_s9, %s1042_s25 }
  0x2b   : > { %579 = vperm.xlu0 %1091, %v561_v9   ;;  %611 = vperm.xlu1 %1092, %v593_v10  }
  0x2c   : > { %v494_v14 = vld.sshfl [vmem:[#allocation1] sm:$0xff pattern:$0x73625140]  ;;  %v495_v15 = vld.sshfl [vmem:[#allocation1 + $0x8] sm:$0xff pattern:$0x73625140] }
  0x2d   : > { %569 = vperm.xlu2 %1093, %v559_v11   ;;  %v504_v16 = vsel %vm503_vm0, %v494_v14, 0  ;;  %v506_v17 = vsel %vm503_vm0, %v495_v15, 0  ;;  %v693_v14 = vld [vmem:[%s461_s23] sm:$0x3] }
  0x2e   : > { %515 = vmatpush.bf16.msra.mxu0 %v504_v16  ;;  %534 = vmatpush.bf16.msra.mxu1 %v506_v17  ;;  %v695_v15 = vperm.slane %v693_v14, 0  ;;  %v696_v16 = vperm.slane %v693_v14, 1 }
  0x31   : > { %1020 = vmatmul.msk.bf16.vlgmr.msra.gmra.mxu0 %vm496_vm1, %v1044_v18  ;;  %1022 = vmatmul.msk.bf16.vlgmr.msra.gmra.mxu1 %vm496_vm1, %v1044_v18 }
  0x33   : > { %596 = vperm.xlu0 %1091, %v590_v12   ;;  %601 = vperm.xlu1 %1092, %v591_v13   ;;  %v1046_v12 = vld [vmem:[%s1376_s5] sm:$0xff]  ;;  %v1047_v13 = vld [vmem:[%s1376_s5 + $0x8] sm:$0xff] }
  0x41   : > { %1021 = vmatmul.msk.bf16.gmra.mxu0 %vm496_vm1, %v1045_v19  ;;  %1023 = vmatmul.msk.bf16.gmra.mxu1 %vm496_vm1, %v1045_v19 }
  0x7f   : > { %v565_v26 = vpop.permute.xlu2 %564 }
  0x87   : > { %v570_v31 = vpop.permute.xlu2 %569 }
  0x95   : > { %v607_v22 = vpop.permute.xlu1 %606  ;;  %v575_v23 = vpop.permute.xlu0 %574 }
  0x9d   : > { %v612_v27 = vpop.permute.xlu1 %611  ;;  %v580_v28 = vpop.permute.xlu0 %579 }
  0xa5   : > { %v602_v38 = vpop.permute.xlu1 %601  ;;  %v597_v48 = vpop.permute.xlu0 %596 }
  0xae   : > { %v517_v20 = vpop.f32.mrf.mxu0  ;;  %v536_v21 = vpop.f32.mrf.mxu1 }
  0xaf   : > { %v582_v42 = vsub.f32 %v517_v20, %v565_v26  ;;  %v583_v43 = vsub.f32 %v536_v21, %v565_v26 }
  0xb1   : > { %v614_v60 = vmul.f32 %v597_v48, %v582_v42  ;;  %v615_v61 = vmul.f32 %v597_v48, %v583_v43 }
  0xb3   : > { %v622_v8 = vadd.f32 %v614_v60, %v550_v62  ;;  %v623_v9 = vadd.f32 %v615_v61, %v551_v63 }
  0xb6   : > { %v519_v24 = vpop.f32.mrf.mxu0  ;;  %v538_v25 = vpop.f32.mrf.mxu1 }
  0xb7   : > { %v584_v36 = vsub.f32 %v519_v24, %v570_v31  ;;  %v585_v37 = vsub.f32 %v538_v25, %v570_v31 }
  0xb9   : > { %v616_v56 = vmul.f32 %v602_v38, %v584_v36  ;;  %v617_v57 = vmul.f32 %v602_v38, %v585_v37 }
  0xbb   : > { %v624_v6 = vadd.f32 %v616_v56, %v552_v54  ;;  %v625_v7 = vadd.f32 %v617_v57, %v553_v55 }
  0xbd   : > { %v634_v10 = vpack.c.bf16 %v624_v6, %v622_v8  ;;  %v635_v11 = vpack.c.bf16 %v625_v7, %v623_v9 }
  0xbe   : > { %v522_v29 = vpop.f32.mrf.mxu0  ;;  %v541_v30 = vpop.f32.mrf.mxu1 }
  0xbf   : > { %v586_v33 = vsub.f32 %v522_v29, %v575_v23  ;;  %v587_v34 = vsub.f32 %v541_v30, %v575_v23  ;;  %v1135_v23 = vmov 0.0  }
  0xc0   : > { %720 = vst.msk [vmem:[%s1292_s15] sm:$0xff] %vm719_vm3, %v1135_v23 }
  0xc1   : > { %v618_v49 = vmul.f32 %v607_v22, %v586_v33  ;;  %v619_v50 = vmul.f32 %v607_v22, %v587_v34  ;;  %721 = vst.msk [vmem:[%s1292_s15 + $0x8] sm:$0xff] %vm719_vm3, %v1135_v23 }
  0xc2   : > { %722 = vst.msk [vmem:[%s1292_s15 + $0x10] sm:$0xff] %vm719_vm3, %v1135_v23 }
  0xc3   : > { %v626_v0 = vadd.f32 %v618_v49, %v554_v39  ;;  %v627_v2 = vadd.f32 %v619_v50, %v555_v40  ;;  %723 = vst.msk [vmem:[%s1292_s15 + $0x18] sm:$0xff] %vm719_vm3, %v1135_v23 }
  0xc4   : > { %724 = vst.msk [vmem:[%s1305_s17] sm:$0xff] %vm719_vm3, %v1135_v23 }
  0xc5   : > { %725 = vst.msk [vmem:[%s1305_s17 + $0x8] sm:$0xff] %vm719_vm3, %v1135_v23 }
  0xc6   : > { %v524_v44 = vpop.f32.mrf.mxu0  ;;  %v543_v45 = vpop.f32.mrf.mxu1  ;;  %726 = vst.msk [vmem:[%s1305_s17 + $0x10] sm:$0xff] %vm719_vm3, %v1135_v23 }
  0xc7   : > { %v588_v51 = vsub.f32 %v524_v44, %v580_v28  ;;  %v589_v52 = vsub.f32 %v543_v45, %v580_v28  ;;  %727 = vst.msk [vmem:[%s1305_s17 + $0x18] sm:$0xff] %vm719_vm3, %v1135_v23  ;;  %v728_v54 = vld [vmem:[%s1292_s15] sm:$0xff] }
  0xc9   : > { %v620_v58 = vmul.f32 %v612_v27, %v588_v51  ;;  %v621_v59 = vmul.f32 %v612_v27, %v589_v52 }
  0xca   : > { %v731_v6 = vld [vmem:[%s1292_s15 + $0x18] sm:$0xff] }
  0xcb   : > { %v628_v1 = vadd.f32 %v620_v58, %v556_v46  ;;  %v629_v3 = vadd.f32 %v621_v59, %v557_v47  ;;  %v753_v57 = vld [vmem:[%s1305_s17] sm:$0xff]  ;;  %v729_v58 = vld [vmem:[%s1292_s15 + $0x8] sm:$0xff] }
  0xcc   : > { %v754_v63 = vld [vmem:[%s1305_s17 + $0x8] sm:$0xff] }
  0xcd   : > { %v636_v4 = vpack.c.bf16 %v628_v1, %v626_v0  ;;  %v637_v5 = vpack.c.bf16 %v629_v3, %v627_v2  ;;  %v730_v0 = vld [vmem:[%s1292_s15 + $0x10] sm:$0xff] }
  0xcf   : > { %661 = vmatpush.bf16.msra.mxu2 %v636_v4  ;;  %680 = vmatpush.bf16.msra.mxu3 %v637_v5  ;;  %v755_v5 = vld [vmem:[%s1305_s17 + $0x10] sm:$0xff] }
  0xd3   : > { %662 = vmatpush.bf16.msra.mxu2 %v634_v10  ;;  %681 = vmatpush.bf16.msra.mxu3 %v635_v11  ;;  %v756_v11 = vld [vmem:[%s1305_s17 + $0x18] sm:$0xff] }
  0xd6   : > { %1032 = vmatmul.msk.bf16.vlgmr.msra.gmra.mxu2 %vm648_vm2, %v1046_v12  ;;  %1034 = vmatmul.msk.bf16.vlgmr.msra.gmra.mxu3 %vm648_vm2, %v1046_v12 }
  0xe6   : > { %1033 = vmatmul.msk.bf16.gmra.mxu2 %vm648_vm2, %v1047_v13  ;;  %1035 = vmatmul.msk.bf16.gmra.mxu3 %vm648_vm2, %v1047_v13 }
 0x159   : > { %v664_v17 = vpop.f32.mrf.mxu2  ;;  %v683_v18 = vpop.f32.mrf.mxu3 }
 0x15a   : > { %v699_v19 = vmul.f32 %v695_v15, %v664_v17  ;;  %v700_v20 = vmul.f32 %v696_v16, %v683_v18 }
 0x15c   : > { %v707_v21 = vpack.c.bf16 %v700_v20, %v699_v19  ;;  %v732_v22 = vadd.f32 %v700_v20, %v699_v19  ;;  %v757_v24 = vmul.f32 %v699_v19, %v699_v19  ;;  %v758_v25 = vmul.f32 %v700_v20, %v700_v20 }
 0x15e   : > { %711 = vst [vmem:[%s1295_s29] sm:$0xff] %v707_v21  ;;  %733 = vadd.xlane.f32.xlu2 %v732_v22  ;;  %v765_v31 = vadd.f32 %v758_v25, %v757_v24 }
 0x161   : > { %v666_v26 = vpop.f32.mrf.mxu2  ;;  %v685_v27 = vpop.f32.mrf.mxu3 }
 0x162   : > { %v701_v28 = vmul.f32 %v695_v15, %v666_v26  ;;  %v702_v29 = vmul.f32 %v696_v16, %v685_v27 }
 0x164   : > { %v708_v30 = vpack.c.bf16 %v702_v29, %v701_v28  ;;  %v735_v32 = vadd.f32 %v702_v29, %v701_v28  ;;  %v759_v33 = vmul.f32 %v701_v28, %v701_v28  ;;  %v760_v34 = vmul.f32 %v702_v29, %v702_v29 }
 0x165   : > { %v840_v14 = vld [vmem:[%s1295_s29] sm:$0xff] (%p1221_p6) }
 0x166   : > { %712 = vst [vmem:[%s1295_s29 + $0x8] sm:$0xff] %v708_v30  ;;  %766 = vadd.xlane.f32.xlu2 %v765_v31  ;;  %736 = vadd.xlane.f32.xlu0 %v735_v32  ;;  %v768_v40 = vadd.f32 %v760_v34, %v759_v33 }
 0x167   : > { %841 = vst [vmem:[%s805_s22] sm:$0xff] (%p1221_p6), %v840_v14 }
 0x169   : > { %v669_v35 = vpop.f32.mrf.mxu2  ;;  %v688_v36 = vpop.f32.mrf.mxu3 }
 0x16a   : > { %v703_v37 = vmul.f32 %v695_v15, %v669_v35  ;;  %v704_v38 = vmul.f32 %v696_v16, %v688_v36 }
 0x16c   : > { %v709_v39 = vpack.c.bf16 %v704_v38, %v703_v37  ;;  %v738_v41 = vadd.f32 %v704_v38, %v703_v37  ;;  %v761_v42 = vmul.f32 %v703_v37, %v703_v37  ;;  %v762_v43 = vmul.f32 %v704_v38, %v704_v38 }
 0x16e   : > { %713 = vst [vmem:[%s1295_s29 + $0x10] sm:$0xff] %v709_v39  ;;  %769 = vadd.xlane.f32.xlu0 %v768_v40  ;;  %739 = vadd.xlane.f32.xlu1 %v738_v41  ;;  %v771_v49 = vadd.f32 %v762_v43, %v761_v42 }
 0x171   : > { %v671_v44 = vpop.f32.mrf.mxu2  ;;  %v690_v45 = vpop.f32.mrf.mxu3 }
 0x172   : > { %v705_v46 = vmul.f32 %v695_v15, %v671_v44  ;;  %v706_v47 = vmul.f32 %v696_v16, %v690_v45  ;;  %v842_v15 = vld [vmem:[%s1295_s29 + $0x8] sm:$0xff] (%p1221_p6) }
 0x173   : > { %843 = vst [vmem:[%s805_s22 + $0x10] sm:$0xff] (%p1221_p6), %v842_v15 }
 0x174   : > { %v710_v48 = vpack.c.bf16 %v706_v47, %v705_v46  ;;  %v741_v50 = vadd.f32 %v706_v47, %v705_v46  ;;  %v763_v51 = vmul.f32 %v705_v46, %v705_v46  ;;  %v764_v52 = vmul.f32 %v706_v47, %v706_v47 }
 0x175   : > { %v844_v16 = vld [vmem:[%s1295_s29 + $0x10] sm:$0xff] (%p1221_p6) }
 0x176   : > { %714 = vst [vmem:[%s1295_s29 + $0x18] sm:$0xff] %v710_v48  ;;  %772 = vadd.xlane.f32.xlu1 %v771_v49  ;;  %742 = vadd.xlane.f32.xlu2 %v741_v50  ;;  %v774_v53 = vadd.f32 %v764_v52, %v763_v51 }
 0x177   : > { %845 = vst [vmem:[%s805_s22 + $0x20] sm:$0xff] (%p1221_p6), %v844_v16 }
 0x17d   : > { %v846_v17 = vld [vmem:[%s1295_s29 + $0x18] sm:$0xff] (%p1221_p6) }
 0x17e   : > { %775 = vadd.xlane.f32.xlu2 %v774_v53  ;;  %847 = vst [vmem:[%s805_s22 + $0x30] sm:$0xff] (%p1221_p6), %v846_v17 }
 0x1d1   : > { %v734_v55 = vpop.xlane.xlu2 %733 }
 0x1d2   : > { %v744_v56 = vadd.f32 %v734_v55, %v728_v54 }
 0x1d4   : > { %749 = vst.msk [vmem:[%s1292_s15] sm:$0xff] %vm719_vm3, %v744_v56 }
 0x1d9   : > { %v767_v59 = vpop.xlane.xlu2 %766  ;;  %v737_v60 = vpop.xlane.xlu0 %736 }
 0x1da   : > { %v777_v61 = vadd.f32 %v767_v59, %v753_v57  ;;  %v745_v62 = vadd.f32 %v737_v60, %v729_v58 }
 0x1dc   : > { %781 = vst.msk [vmem:[%s1305_s17] sm:$0xff] %vm719_vm3, %v777_v61 }
 0x1dd   : > { %750 = vst.msk [vmem:[%s1292_s15 + $0x8] sm:$0xff] %vm719_vm3, %v745_v62 }
 0x1e1   : > { %v770_v1 = vpop.xlane.xlu0 %769  ;;  %v740_v2 = vpop.xlane.xlu1 %739 }
 0x1e2   : > { %v778_v3 = vadd.f32 %v770_v1, %v754_v63  ;;  %v746_v4 = vadd.f32 %v740_v2, %v730_v0 }
 0x1e4   : > { %782 = vst.msk [vmem:[%s1305_s17 + $0x8] sm:$0xff] %vm719_vm3, %v778_v3 }
 0x1e5   : > { %751 = vst.msk [vmem:[%s1292_s15 + $0x10] sm:$0xff] %vm719_vm3, %v746_v4 }
 0x1e9   : > { %v773_v7 = vpop.xlane.xlu1 %772  ;;  %v743_v8 = vpop.xlane.xlu2 %742 }
 0x1ea   : > { %v779_v9 = vadd.f32 %v773_v7, %v755_v5  ;;  %v747_v10 = vadd.f32 %v743_v8, %v731_v6 }
 0x1ec   : > { %783 = vst.msk [vmem:[%s1305_s17 + $0x10] sm:$0xff] %vm719_vm3, %v779_v9 }
 0x1ed   : > { %752 = vst.msk [vmem:[%s1292_s15 + $0x18] sm:$0xff] %vm719_vm3, %v747_v10 }
 0x1f0   : > { %801 = sbr.rel (!%p1221_p6) target bundleno = 501 (0x1f5), region = 94 }
 0x1f1   : > { %v776_v12 = vpop.xlane.xlu2 %775 }
 0x1f2   : > { %v780_v13 = vadd.f32 %v776_v12, %v756_v11 }
 0x1f4   : > { %784 = vst.msk [vmem:[%s1305_s17 + $0x18] sm:$0xff] %vm719_vm3, %v780_v13 }
 0x1f5 PF: > { %s20_s13 = sadd.s32 1, %s1132_s13   ;;  %s1382_s30 = smov %s1120_s10 }
 0x1f6   : > { %p17_p13 = scmp.ge.s32.totalorder %s20_s13, 4   ;;  %s1383_s10 = smov %s1226_s19 }
 0x1f7   : > { %s1384_s11 = smov %s1128_s12  ;;  %s1385_s12 = smov %s1387_s14 }
 0x1f8   :  { %19 = sbr.rel (!%p17_p13) target bundleno = 3 (0x3), region = 193 }

// kernel: nn_forward.13
= control target key start
LH: loop header
LB: loop body
LE: loop exit
PB: predicated region body
PF: predicated region fallthrough
CT: control target
= control target key end

     0   :  { %s1037_s15 = smov 0   ;;  %s1039_s16 = smov 0   ;;  %s1257_s0 = inlined_call_operand.vmem [shape: bf16[288,512], index: 0, kind: input, shape index: {}]   ;;  %s1258_s1 = inlined_call_operand.vmem [shape: bf16[8,288], index: 1, kind: input, shape index: {}]   ;;  %s1259_s2 = inlined_call_operand.vmem [shape: f32[8,1], index: 2, kind: input, shape index: {}]   ;;  %s1260_s3 = inlined_call_operand.vmem [shape: f32[8,1], index: 3, kind: input, shape index: {}]   ;;  %s1261_s4 = inlined_call_operand.vmem [shape: f32[8,512], index: 4, kind: output, shape index: {}]  }
   0x1   :  { %s1041_s17 = smov 0  }
   0x2 LB: > { %s765_s18 = sadd.s32 4294967295, %s1009_s17   ;;  %s1054_s19 = sadd.s32 1, %s1009_s17   ;;  %s1009_s17 = sphi %s1041_s17, %s1264_s17   ;;  %s1005_s16 = sphi %s1039_s16, %s1263_s16   ;;  %s1001_s15 = sphi %s1037_s15, %s1262_s15  }
   0x3   : > { %s18_s20 = ssub.s32 %s1009_s17, %s1054_s19  ;;  %s21_s21 = sadd.s32 1, %s1005_s16 }
   0x4   : > { %p19_p0 = scmp.eq.s32.totalorder %s18_s20, 0  ;;  %p28_p1 = scmp.ne.s32.totalorder %s1005_s16, %s1001_s15 }
   0x5   : > { %p29_p2 = scmp.eq.s32.totalorder %s1009_s17, 0  ;;  %p768_p4 = scmp.ge.s32.totalorder %s1009_s17, 2 }
   0x6   : > { %s1063_s22 = scalar_select %p19_p0, %s1005_s16, %s21_s21  }
   0x7   : > { %p30_p3 = por %p29_p2, %p28_p1  ;;  %152 = sbr.rel (%p768_p4) target bundleno = 52 (0x34), region = 28 }
   0xc   : > { %155 = sbr.rel (!%p30_p3) target bundleno = 52 (0x34), region = 32  ;;  %s157_s23 = sand.u32 (%p30_p3), 1, %s1005_s16  }
   0xd   : > { %s922_s24 = sshll.u32 (%p30_p3), %s1009_s17, 3  ;;  %s959_s25 = smul.u32 (%p30_p3), 288, %s157_s23 }
   0xe   : > { %s1071_s28 = scalar_lea.vmem (%p30_p3), %s1257_s0, %s922_s24 }
   0xf   : > { %v261_v0 = vld [vmem:[%s1071_s28] sm:$0xff] (%p30_p3)  ;;  %v263_v1 = vld [vmem:[%s1071_s28 + $0x10] sm:$0xff] (%p30_p3)  ;;  %s1076_s29 = scalar_lea.vmem (%p30_p3), [#allocation2], %s959_s25 }
  0x10   : > { %v265_v2 = vld [vmem:[%s1071_s28 + $0x20] sm:$0xff] (%p30_p3)  ;;  %262 = vst [vmem:[%s1076_s29] sm:$0xff] (%p30_p3), %v261_v0  ;;  %v267_v3 = vld [vmem:[%s1071_s28 + $0x30] sm:$0xff] (%p30_p3) }
  0x11   : > { %264 = vst [vmem:[%s1076_s29 + $0x8] sm:$0xff] %v263_v1  ;;  %v269_v4 = vld [vmem:[%s1071_s28 + $0x40] sm:$0xff]  ;;  %v271_v5 = vld [vmem:[%s1071_s28 + $0x50] sm:$0xff] }
  0x12   : > { %266 = vst [vmem:[%s1076_s29 + $0x10] sm:$0xff] %v265_v2  ;;  %v273_v6 = vld [vmem:[%s1071_s28 + $0x60] sm:$0xff]  ;;  %v275_v7 = vld [vmem:[%s1071_s28 + $0x70] sm:$0xff] }
  0x13   : > { %268 = vst [vmem:[%s1076_s29 + $0x18] sm:$0xff] %v267_v3  ;;  %v277_v8 = vld [vmem:[%s1071_s28 + $0x80] sm:$0xff]  ;;  %v279_v9 = vld [vmem:[%s1071_s28 + $0x90] sm:$0xff] }
  0x14   : > { %270 = vst [vmem:[%s1076_s29 + $0x20] sm:$0xff] %v269_v4  ;;  %v281_v10 = vld [vmem:[%s1071_s28 + $0xa0] sm:$0xff]  ;;  %v283_v11 = vld [vmem:[%s1071_s28 + $0xb0] sm:$0xff] }
  0x15   : > { %272 = vst [vmem:[%s1076_s29 + $0x28] sm:$0xff] %v271_v5  ;;  %v285_v12 = vld [vmem:[%s1071_s28 + $0xc0] sm:$0xff]  ;;  %v287_v13 = vld [vmem:[%s1071_s28 + $0xd0] sm:$0xff] }
  0x16   : > { %274 = vst [vmem:[%s1076_s29 + $0x30] sm:$0xff] %v273_v6  ;;  %v289_v14 = vld [vmem:[%s1071_s28 + $0xe0] sm:$0xff]  ;;  %v291_v15 = vld [vmem:[%s1071_s28 + $0xf0] sm:$0xff] }
  0x17   : > { %276 = vst [vmem:[%s1076_s29 + $0x38] sm:$0xff] %v275_v7  ;;  %v293_v16 = vld [vmem:[%s1071_s28 + $0x100] sm:$0xff]  ;;  %v295_v17 = vld [vmem:[%s1071_s28 + $0x110] sm:$0xff] }
  0x18   : > { %278 = vst [vmem:[%s1076_s29 + $0x40] sm:$0xff] %v277_v8  ;;  %v297_v18 = vld [vmem:[%s1071_s28 + $0x120] sm:$0xff]  ;;  %v299_v19 = vld [vmem:[%s1071_s28 + $0x130] sm:$0xff] }
  0x19   : > { %280 = vst [vmem:[%s1076_s29 + $0x48] sm:$0xff] %v279_v9  ;;  %v301_v20 = vld [vmem:[%s1071_s28 + $0x140] sm:$0xff]  ;;  %v303_v21 = vld [vmem:[%s1071_s28 + $0x150] sm:$0xff] }
  0x1a   : > { %282 = vst [vmem:[%s1076_s29 + $0x50] sm:$0xff] %v281_v10  ;;  %v305_v22 = vld [vmem:[%s1071_s28 + $0x160] sm:$0xff]  ;;  %v307_v23 = vld [vmem:[%s1071_s28 + $0x170] sm:$0xff] }
  0x1b   : > { %284 = vst [vmem:[%s1076_s29 + $0x58] sm:$0xff] %v283_v11  ;;  %v309_v24 = vld [vmem:[%s1071_s28 + $0x180] sm:$0xff]  ;;  %v311_v25 = vld [vmem:[%s1071_s28 + $0x190] sm:$0xff] }
  0x1c   : > { %286 = vst [vmem:[%s1076_s29 + $0x60] sm:$0xff] %v285_v12  ;;  %v313_v26 = vld [vmem:[%s1071_s28 + $0x1a0] sm:$0xff]  ;;  %v315_v27 = vld [vmem:[%s1071_s28 + $0x1b0] sm:$0xff] }
  0x1d   : > { %288 = vst [vmem:[%s1076_s29 + $0x68] sm:$0xff] %v287_v13  ;;  %v317_v28 = vld [vmem:[%s1071_s28 + $0x1c0] sm:$0xff]  ;;  %v319_v29 = vld [vmem:[%s1071_s28 + $0x1d0] sm:$0xff] }
  0x1e   : > { %290 = vst [vmem:[%s1076_s29 + $0x70] sm:$0xff] %v289_v14  ;;  %v321_v30 = vld [vmem:[%s1071_s28 + $0x1e0] sm:$0xff]  ;;  %v323_v31 = vld [vmem:[%s1071_s28 + $0x1f0] sm:$0xff] }
  0x1f   : > { %292 = vst [vmem:[%s1076_s29 + $0x78] sm:$0xff] %v291_v15  ;;  %v325_v32 = vld [vmem:[%s1071_s28 + $0x200] sm:$0xff]  ;;  %v327_v33 = vld [vmem:[%s1071_s28 + $0x210] sm:$0xff] }
  0x20   : > { %294 = vst [vmem:[%s1076_s29 + $0x80] sm:$0xff] %v293_v16  ;;  %v329_v34 = vld [vmem:[%s1071_s28 + $0x220] sm:$0xff]  ;;  %v331_v35 = vld [vmem:[%s1071_s28 + $0x230] sm:$0xff] }
  0x21   : > { %296 = vst [vmem:[%s1076_s29 + $0x88] sm:$0xff] %v295_v17 }
  0x22   : > { %298 = vst [vmem:[%s1076_s29 + $0x90] sm:$0xff] %v297_v18 }
  0x23   : > { %300 = vst [vmem:[%s1076_s29 + $0x98] sm:$0xff] %v299_v19 }
  0x24   : > { %302 = vst [vmem:[%s1076_s29 + $0xa0] sm:$0xff] %v301_v20 }
  0x25   : > { %304 = vst [vmem:[%s1076_s29 + $0xa8] sm:$0xff] %v303_v21 }
  0x26   : > { %306 = vst [vmem:[%s1076_s29 + $0xb0] sm:$0xff] %v305_v22 }
  0x27   : > { %308 = vst [vmem:[%s1076_s29 + $0xb8] sm:$0xff] %v307_v23 }
  0x28   : > { %310 = vst [vmem:[%s1076_s29 + $0xc0] sm:$0xff] %v309_v24 }
  0x29   : > { %312 = vst [vmem:[%s1076_s29 + $0xc8] sm:$0xff] %v311_v25 }
  0x2a   : > { %314 = vst [vmem:[%s1076_s29 + $0xd0] sm:$0xff] %v313_v26 }
  0x2b   : > { %316 = vst [vmem:[%s1076_s29 + $0xd8] sm:$0xff] %v315_v27 }
  0x2c   : > { %318 = vst [vmem:[%s1076_s29 + $0xe0] sm:$0xff] %v317_v28 }
  0x2d   : > { %320 = vst [vmem:[%s1076_s29 + $0xe8] sm:$0xff] %v319_v29 }
  0x2e   : > { %322 = vst [vmem:[%s1076_s29 + $0xf0] sm:$0xff] %v321_v30 }
  0x2f   : > { %324 = vst [vmem:[%s1076_s29 + $0xf8] sm:$0xff] %v323_v31 }
  0x30   : > { %326 = vst [vmem:[%s1076_s29 + $0x100] sm:$0xff] %v325_v32 }
  0x31   : > { %328 = vst [vmem:[%s1076_s29 + $0x108] sm:$0xff] %v327_v33 }
  0x32   : > { %330 = vst [vmem:[%s1076_s29 + $0x110] sm:$0xff] %v329_v34 }
  0x33   : > { %332 = vst [vmem:[%s1076_s29 + $0x118] sm:$0xff] %v331_v35 }
  0x34 PF: > { %p771_p5 = scmp.ge.s32.totalorder %s1009_s17, 1  ;;  %p337_p6 = scmp.lt.s32.totalorder %s1009_s17, 3 }
  0x36   : > { %p338_p7 = pnand %p771_p5, %p337_p6 }
  0x37   : > { %s344_s30 = sand.u32 (!%p338_p7), 1, %s1001_s15   ;;  %s772_s15 = sshll.u32 (!%p338_p7), %s765_s18, 1 }
  0x38   : > { %341 = sbr.rel (%p338_p7) target bundleno = 245 (0xf5), region = 70  ;;  %p371_p8 = scmp.lt.s32.totalorder (!%p338_p7), %s772_s15, 3 }
  0x39   : > { %s960_s5 = smul.u32 (!%p338_p7), 288, %s344_s30 }
  0x3b   : > { %s1153_s8 = scalar_lea.vmem (!%p338_p7), [#allocation2], %s960_s5 }
  0x3d   : > { %v378_v36 = vld [vmem:[%s1258_s1 + $0x8] sm:$0xf]  ;;  %v832_v37 = vld [vmem:[%s1153_s8 + $0x70] sm:$0xf]  ;;  %v938_v38 = vld [vmem:[%s1153_s8 + $0x74] sm:$0xf0] }
  0x3e   : > { %v912_v39 = vld [vmem:[%s1153_s8 + $0x110] sm:$0xf]  ;;  %vm611_vm0 = vcmask 261120   ;;  %v833_v40 = vor.u32 %v938_v38, %v832_v37  ;;  %v958_v41 = vld [vmem:[%s1153_s8 + $0x114] sm:$0xf0]  ;;  %v425_v53 = vunpack.c.l.b16 %v378_v36  ;;  %s1266_s15 = smov (!%p371_p8, %s772_s15), 3 }
  0x3f   : > { %v937_v42 = vld [vmem:[%s1153_s8 + $0x74] sm:$0xf]  ;;  %v834_v43 = vld [vmem:[%s1153_s8 + $0x78] sm:$0xf0]  ;;  %v913_v44 = vor.u32 %v958_v41, %v912_v39  ;;  %v896_v46 = vld [vmem:[%s1153_s8 + $0xf0] sm:$0xf] }
  0x40   : > { %v837_v45 = vor.u32 %v937_v42, %v834_v43  ;;  %v954_v47 = vld [vmem:[%s1153_s8 + $0xf4] sm:$0xf0]  ;;  %v824_v48 = vld [vmem:[%s1153_s8 + $0x60] sm:$0xf]  ;;  %615 = vmatpush.bf16.msra.mxu0 %v833_v40  ;;  %v936_v50 = vld [vmem:[%s1153_s8 + $0x64] sm:$0xf0]  ;;  %v1179_v8 = vpack.c.b16 %v425_v53, %v425_v53 }
  0x41   : > { %v897_v49 = vor.u32 %v954_v47, %v896_v46  ;;  %v904_v51 = vld [vmem:[%s1153_s8 + $0x100] sm:$0xf]  ;;  %v956_v52 = vld [vmem:[%s1153_s8 + $0x104] sm:$0xf0]  ;;  %647 = vmatpush.bf16.msra.mxu2 %v913_v44  ;;  %v825_v54 = vor.u32 %v936_v50, %v824_v48  ;;  %v935_v56 = vld [vmem:[%s1153_s8 + $0x64] sm:$0xf] }
  0x42   : > { %654 = vmatpush.bf16.msra.mxu3 %v837_v45  ;;  %v905_v55 = vor.u32 %v956_v52, %v904_v51  ;;  %v826_v57 = vld [vmem:[%s1153_s8 + $0x68] sm:$0xf0]  ;;  %v953_v58 = vld [vmem:[%s1153_s8 + $0xf4] sm:$0xf]  ;;  %v898_v60 = vld [vmem:[%s1153_s8 + $0xf8] sm:$0xf0] }
  0x43   : > { %628 = vmatpush.bf16.msra.mxu1 %v897_v49  ;;  %v829_v59 = vor.u32 %v935_v56, %v826_v57  ;;  %v888_v61 = vld [vmem:[%s1153_s8 + $0xe0] sm:$0xf]  ;;  %v952_v62 = vld [vmem:[%s1153_s8 + $0xe4] sm:$0xf0]  ;;  %v901_v63 = vor.u32 %v953_v58, %v898_v60  ;;  %v816_v1 = vld [vmem:[%s1153_s8 + $0x50] sm:$0xf] }
  0x44   : > { %v889_v0 = vor.u32 %v952_v62, %v888_v61  ;;  %v934_v2 = vld [vmem:[%s1153_s8 + $0x54] sm:$0xf0]  ;;  %v933_v3 = vld [vmem:[%s1153_s8 + $0x54] sm:$0xf]  ;;  %616 = vmatpush.bf16.msra.mxu0 %v825_v54  ;;  %v818_v5 = vld [vmem:[%s1153_s8 + $0x58] sm:$0xf0] }
  0x45   : > { %v817_v4 = vor.u32 %v934_v2, %v816_v1  ;;  %v951_v6 = vld [vmem:[%s1153_s8 + $0xe4] sm:$0xf]  ;;  %v890_v7 = vld [vmem:[%s1153_s8 + $0xe8] sm:$0xf0]  ;;  %648 = vmatpush.bf16.msra.mxu2 %v905_v55  ;;  %v821_v9 = vor.u32 %v933_v3, %v818_v5  ;;  %v880_v10 = vld [vmem:[%s1153_s8 + $0xd0] sm:$0xf] }
  0x46   : > { %655 = vmatpush.bf16.msra.mxu3 %v829_v59  ;;  %v950_v11 = vld [vmem:[%s1153_s8 + $0xd4] sm:$0xf0]  ;;  %v808_v12 = vld [vmem:[%s1153_s8 + $0x40] sm:$0xf]  ;;  %v893_v13 = vor.u32 %v951_v6, %v890_v7  ;;  %v932_v15 = vld [vmem:[%s1153_s8 + $0x44] sm:$0xf0] }
  0x47   : > { %629 = vmatpush.bf16.msra.mxu1 %v889_v0  ;;  %v881_v14 = vor.u32 %v950_v11, %v880_v10  ;;  %v931_v16 = vld [vmem:[%s1153_s8 + $0x44] sm:$0xf]  ;;  %v810_v17 = vld [vmem:[%s1153_s8 + $0x48] sm:$0xf0]  ;;  %v949_v18 = vld [vmem:[%s1153_s8 + $0xd4] sm:$0xf]  ;;  %v809_v21 = vor.u32 %v932_v15, %v808_v12 }
  0x48   : > { %v882_v19 = vld [vmem:[%s1153_s8 + $0xd8] sm:$0xf0]  ;;  %v872_v20 = vld [vmem:[%s1153_s8 + $0xc0] sm:$0xf]  ;;  %617 = vmatpush.bf16.msra.mxu0 %v817_v4  ;;  %v948_v22 = vld [vmem:[%s1153_s8 + $0xc4] sm:$0xf0]  ;;  %918 = vmatmul.msk.bf16.vlgmr.msra.gmra.mxu2 %vm611_vm0, %v1179_v8  ;;  %v813_v23 = vor.u32 %v931_v16, %v810_v17 }
  0x49   : > { %667 = vmatpush.bf16.msrb.mxu2 %v901_v63  ;;  %v800_v24 = vld [vmem:[%s1153_s8 + $0x30] sm:$0xf]  ;;  %v930_v25 = vld [vmem:[%s1153_s8 + $0x34] sm:$0xf0]  ;;  %v885_v26 = vor.u32 %v949_v18, %v882_v19  ;;  %v873_v27 = vor.u32 %v948_v22, %v872_v20  ;;  %v929_v28 = vld [vmem:[%s1153_s8 + $0x34] sm:$0xf] }
  0x4a   : > { %656 = vmatpush.bf16.msra.mxu3 %v821_v9  ;;  %v802_v29 = vld [vmem:[%s1153_s8 + $0x38] sm:$0xf0]  ;;  %v947_v30 = vld [vmem:[%s1153_s8 + $0xc4] sm:$0xf]  ;;  %v874_v31 = vld [vmem:[%s1153_s8 + $0xc8] sm:$0xf0]  ;;  %v801_v34 = vor.u32 %v930_v25, %v800_v24 }
  0x4b   : > { %630 = vmatpush.bf16.msra.mxu1 %v881_v14  ;;  %v864_v32 = vld [vmem:[%s1153_s8 + $0xb0] sm:$0xf]  ;;  %v946_v33 = vld [vmem:[%s1153_s8 + $0xb4] sm:$0xf0]  ;;  %v805_v35 = vor.u32 %v929_v28, %v802_v29  ;;  %v792_v36 = vld [vmem:[%s1153_s8 + $0x20] sm:$0xf]  ;;  %v877_v38 = vor.u32 %v947_v30, %v874_v31 }
  0x4c   : > { %618 = vmatpush.bf16.msra.mxu0 %v809_v21  ;;  %v928_v37 = vld [vmem:[%s1153_s8 + $0x24] sm:$0xf0]  ;;  %v865_v39 = vor.u32 %v946_v33, %v864_v32  ;;  %v927_v40 = vld [vmem:[%s1153_s8 + $0x24] sm:$0xf]  ;;  %v794_v41 = vld [vmem:[%s1153_s8 + $0x28] sm:$0xf0] }
  0x4d   : > { %668 = vmatpush.bf16.msrb.mxu2 %v893_v13  ;;  %v945_v42 = vld [vmem:[%s1153_s8 + $0xb4] sm:$0xf]  ;;  %v866_v43 = vld [vmem:[%s1153_s8 + $0xb8] sm:$0xf0]  ;;  %v856_v44 = vld [vmem:[%s1153_s8 + $0xa0] sm:$0xf]  ;;  %v793_v46 = vor.u32 %v928_v37, %v792_v36  ;;  %v797_v47 = vor.u32 %v927_v40, %v794_v41 }
  0x4e   : > { %657 = vmatpush.bf16.msra.mxu3 %v813_v23  ;;  %v944_v45 = vld [vmem:[%s1153_s8 + $0xa4] sm:$0xf0]  ;;  %v784_v48 = vld [vmem:[%s1153_s8 + $0x10] sm:$0xf]  ;;  %v926_v49 = vld [vmem:[%s1153_s8 + $0x14] sm:$0xf0]  ;;  %v869_v50 = vor.u32 %v945_v42, %v866_v43 }
  0x4f   : > { %631 = vmatpush.bf16.msra.mxu1 %v873_v27  ;;  %v857_v51 = vor.u32 %v944_v45, %v856_v44  ;;  %v925_v52 = vld [vmem:[%s1153_s8 + $0x14] sm:$0xf]  ;;  %v786_v53 = vld [vmem:[%s1153_s8 + $0x18] sm:$0xf0]  ;;  %v943_v54 = vld [vmem:[%s1153_s8 + $0xa4] sm:$0xf]  ;;  %v785_v58 = vor.u32 %v926_v49, %v784_v48 }
  0x50   : > { %619 = vmatpush.bf16.msra.mxu0 %v801_v34  ;;  %v858_v55 = vld [vmem:[%s1153_s8 + $0xa8] sm:$0xf0]  ;;  %v848_v56 = vld [vmem:[%s1153_s8 + $0x90] sm:$0xf]  ;;  %v942_v57 = vld [vmem:[%s1153_s8 + $0x94] sm:$0xf0]  ;;  %v789_v62 = vor.u32 %v925_v52, %v786_v53 }
  0x51   : > { %669 = vmatpush.bf16.msrb.mxu2 %v885_v26  ;;  %v776_v59 = vld [vmem:[%s1153_s8] sm:$0xf]  ;;  %v924_v63 = vld [vmem:[%s1153_s8 + $0x4] sm:$0xf0]  ;;  %v923_v0 = vld [vmem:[%s1153_s8 + $0x4] sm:$0xf]  ;;  %v861_v3 = vor.u32 %v943_v54, %v858_v55  ;;  %v849_v4 = vor.u32 %v942_v57, %v848_v56 }
  0x52   : > { %658 = vmatpush.bf16.msra.mxu3 %v805_v35  ;;  %v377_v60 = vld [vmem:[%s1258_s1] sm:$0xff]  ;;  %v778_v1 = vld [vmem:[%s1153_s8 + $0x8] sm:$0xf0]  ;;  %v1011_v2 = vmov 0   ;;  %v941_v5 = vld [vmem:[%s1153_s8 + $0x94] sm:$0xf]  ;;  %v777_v13 = vor.u32 %v924_v63, %v776_v59 }
  0x53   : > { %632 = vmatpush.bf16.msra.mxu1 %v865_v39  ;;  %v415_v61 = vld [vmem:[%s1259_s2] sm:$0xff]  ;;  %986 = vset.pattern.permute.xlu0 %v1011_v2  ;;  %v957_v6 = vld [vmem:[%s1153_s8 + $0x114] sm:$0xf]  ;;  %v914_v7 = vld [vmem:[%s1153_s8 + $0x118] sm:$0xf0]  ;;  %v423_v12 = vunpack.c.l.b16 %v377_v60  ;;  %v781_v14 = vor.u32 %v923_v0, %v778_v1  ;;  %v424_v16 = vunpack.c.h.b16 %v377_v60  ;;  %s773_s20 = sshll.u32 %s1266_s15, 3 }
  0x54   : > { %620 = vmatpush.bf16.msra.mxu0 %v793_v46  ;;  %v850_v9 = vld [vmem:[%s1153_s8 + $0x98] sm:$0xf0]  ;;  %v840_v10 = vld [vmem:[%s1153_s8 + $0x80] sm:$0xf]  ;;  %v940_v11 = vld [vmem:[%s1153_s8 + $0x84] sm:$0xf0]  ;;  %418 = vperm.xlu0 %986, %v415_v61   ;;  %v917_v15 = vor.u32 %v957_v6, %v914_v7  ;;  %s374_s24 = scalar_lea.vmem %s1261_s4, %s773_s20 }
  0x55   : > { %670 = vmatpush.bf16.msrb.mxu2 %v877_v38  ;;  %v853_v17 = vor.u32 %v941_v5, %v850_v9  ;;  %v841_v18 = vor.u32 %v940_v11, %v840_v10  ;;  %v955_v19 = vld [vmem:[%s1153_s8 + $0x104] sm:$0xf]  ;;  %v906_v20 = vld [vmem:[%s1153_s8 + $0x108] sm:$0xf0]  ;;  %v426_v21 = vpack.c.b16 %v423_v12, %v423_v12  ;;  %v427_v25 = vpack.c.b16 %v424_v16, %v424_v16 }
  0x56   : > { %659 = vmatpush.bf16.msra.mxu3 %v797_v47  ;;  %v939_v22 = vld [vmem:[%s1153_s8 + $0x84] sm:$0xf]  ;;  %v842_v23 = vld [vmem:[%s1153_s8 + $0x88] sm:$0xf0]  ;;  %v909_v26 = vor.u32 %v955_v19, %v906_v20 }
  0x57   : > { %633 = vmatpush.bf16.msra.mxu1 %v857_v51  ;;  %v693_v24 = vld [vmem:[%s1260_s3] sm:$0xff]  ;;  %v845_v27 = vor.u32 %v939_v22, %v842_v23 }
  0x58   : > { %621 = vmatpush.bf16.msra.mxu0 %v785_v58 }
  0x59   : > { %671 = vmatpush.bf16.msrb.mxu2 %v869_v50 }
  0x5a   : > { %660 = vmatpush.bf16.msra.mxu3 %v789_v62 }
  0x5b   : > { %634 = vmatpush.bf16.msra.mxu1 %v849_v4 }
  0x5c   : > { %622 = vmatpush.bf16.msra.mxu0 %v777_v13  ;;  %696 = vperm.xlu0 %986, %v693_v24  }
  0x5d   : > { %672 = vmatpush.bf16.msrb.mxu2 %v861_v3 }
  0x5e   : > { %661 = vmatpush.bf16.msra.mxu3 %v781_v14 }
  0x5f   : > { %635 = vmatpush.bf16.msra.mxu1 %v841_v18  ;;  %623 = vmatmul.bf16.vlgmr.msra.gmra.mxu0 %v426_v21 }
  0x60   : > { %686 = vmatpush.bf16.msrb.mxu0 %v917_v15 }
  0x61   : > { %673 = vmatpush.bf16.msrb.mxu2 %v853_v17  ;;  %662 = vmatmul.bf16.vlgmr.msra.gmra.mxu3 %v426_v21 }
  0x62   : > { %636 = vmatmul.bf16.vlgmr.msra.gmra.mxu1 %v427_v25 }
  0x64   : > { %687 = vmatpush.bf16.msrb.mxu0 %v909_v26 }
  0x65   : > { %674 = vmatpush.bf16.msrb.mxu2 %v845_v27 }
  0x68   : > { %675 = vmatmul.bf16.vlgmr.msrb.gmra.mxu2 %v427_v25 }
  0x6f   : > { %919 = vmatmul.msk.bf16.vlgmr.msrb.gmra.mxu0 %vm611_vm0, %v1179_v8 }
  0xc6   : > { %v419_v30 = vpop.permute.xlu0 %418 }
  0xcb   : > { %v650_v28 = vpop.f32.mrf.mxu2 }
  0xce   : > { %v697_v35 = vpop.permute.xlu0 %696 }
  0xd3   : > { %v652_v29 = vpop.f32.mrf.mxu2 }
  0xdc   : > { %v624_v31 = vpop.f32.mrf.mxu0 }
  0xdd   : > { %v625_v32 = vadd.f32 %v624_v31, %v419_v30 }
  0xdf   : > { %v637_v33 = vpop.f32.mrf.mxu1 }
  0xe0   : > { %v638_v34 = vadd.f32 %v637_v33, %v625_v32 }
  0xe2   : > { %v651_v36 = vadd.f32 %v650_v28, %v638_v34 }
  0xe4   : > { %v699_v37 = vmul.f32 %v697_v35, %v651_v36  ;;  %v663_v8 = vpop.f32.mrf.mxu3  ;;  %v626_v38 = vpop.f32.mrf.mxu0 }
  0xe5   : > { %v664_v39 = vadd.f32 %v663_v8, %v419_v30 }
  0xe6   : > { %701 = vst [vmem:[%s374_s24] sm:$0xff] %v699_v37 }
  0xe7   : > { %v639_v40 = vpop.f32.mrf.mxu1 }
  0xeb   : > { %v676_v41 = vpop.f32.mrf.mxu2 }
  0xec   : > { %v677_v42 = vadd.f32 %v676_v41, %v664_v39  ;;  %v665_v43 = vpop.f32.mrf.mxu3  ;;  %v689_v44 = vpop.f32.mrf.mxu0 }
  0xee   : > { %v690_v45 = vadd.f32 %v689_v44, %v677_v42 }
  0xf0   : > { %v700_v46 = vmul.f32 %v697_v35, %v690_v45 }
  0xf2   : > { %702 = vst [vmem:[%s374_s24 + $0x8] sm:$0xff] %v700_v46 }
  0xf3   : > { %v678_v47 = vpop.f32.mrf.mxu2 }
  0xf4   : > { %v691_v48 = vpop.f32.mrf.mxu0 }
  0xf5 PF: > { %p11_p9 = scmp.ge.s32.totalorder %s1054_s19, 4   ;;  %s1262_s15 = smov %s1005_s16 }
  0xf6   : > { %s1263_s16 = smov %s1063_s22  ;;  %s1264_s17 = smov %s1054_s19 }
  0xf7   :  { %13 = sbr.rel (!%p11_p9) target bundleno = 2 (0x2), region = 109 }

</bundles_post_ra>
